<compile_context>
chip_gen: v5e
topology: v5e:2x2
jax: 0.10.0
libtpu: 0.0.40
codegen_flags: <defaults>
</compile_context>

<pallas_src>
import numpy as np
import jax
import jax.numpy as jnp
from jax.experimental import pallas as pl
from jax.experimental.pallas import tpu as pltpu

# ----- feature dimensions from the reference module -----
ELEM_LIST = list(range(1, 119))
ATOM_FDIM = len(ELEM_LIST) + 6 + 5 + 4 + 5 + 1      # 139
BOND_FDIM = 5 + 6                                    # 11
BOND_INPUT_FDIM = ATOM_FDIM + BOND_FDIM              # 150 (atom_messages=False)

HIDDEN = 32
DEPTH = 3
LANE = 128


def _round_up(x, m):
    return -(-x // m) * m


# ============================ fused Pallas kernel ============================

def _mpn_fused_kernel(fa_ref, fbb_ref, a2b_ref, b2a_ref, rodd_ref, reven_ref, pool_ref,
                      wia_ref, wib_ref, wh_ref, woa_ref, wom_ref, bo_ref,
                      out_ref):
    f32 = jnp.float32
    fa = fa_ref[...]                          # (NAp, FAp) f32, zero-padded
    a2b = a2b_ref[...].astype(f32)            # (NAp, NBp) incidence: atom <- incoming bonds
    b2a = b2a_ref[...].astype(f32)            # (NBp, NAp) one-hot: bond -> source atom
    wh = wh_ref[...]                          # (Hp, Hp)
    rodd = rodd_ref[...]                      # (NBp, 1) parity mask (odd bonds, rev = b+1)
    reven = reven_ref[...]                    # (NBp, 1) parity mask (even bonds, rev = b-1)
    nbp = b2a.shape[0]

    # input = W_i(f_bonds), with f_bonds[b] = [f_atoms[b2a[b]] | bond_feats[b]] split so the
    # 139-wide atom part is projected once per atom and gathered via the B2A matmul.
    atom_proj = jnp.dot(fa, wia_ref[...], preferred_element_type=f32)            # (NAp, Hp)
    inp = (jnp.dot(b2a, atom_proj, preferred_element_type=f32)
           + jnp.dot(fbb_ref[...], wib_ref[...], preferred_element_type=f32))    # (NBp, Hp)
    message = jnp.maximum(inp, 0.0)           # act_func = ReLU

    # depth loop fully fused; message/inp never leave VMEM.
    for _ in range(DEPTH - 1):
        a_msg = jnp.dot(a2b, message, preferred_element_type=f32)     # sum of incoming bond msgs / atom
        gathered = jnp.dot(b2a, a_msg, preferred_element_type=f32)    # a_message[b2a]
        # rev_message = message[b2revb]: bonds come in (b, b+1) reverse pairs, so the gather
        # is an adjacent-row swap -> two sublane rolls (XLU) selected by parity masks.
        rev = (rodd * pltpu.roll(message, shift=nbp - 1, axis=0)      # row b <- message[b+1]
               + reven * pltpu.roll(message, shift=1, axis=0))        # row b <- message[b-1]
        upd = jnp.dot(gathered - rev, wh, preferred_element_type=f32)
        message = jnp.maximum(inp + upd, 0.0)                         # dropout p=0.0 -> identity

    # readout: atom_hiddens = ReLU(W_o([f_atoms, a_message]) + b_o); per-molecule mean pool.
    a_msg = jnp.dot(a2b, message, preferred_element_type=f32)
    h = (jnp.dot(fa, woa_ref[...], preferred_element_type=f32)
         + jnp.dot(a_msg, wom_ref[...], preferred_element_type=f32)
         + bo_ref[...])
    atom_h = jnp.maximum(h, 0.0)
    out_ref[...] = jnp.dot(pool_ref[...], atom_h, preferred_element_type=f32)


_VMEM = pl.BlockSpec(memory_space=pltpu.MemorySpace.VMEM)


@jax.jit
def mpn_forward(f_atoms_p, f_bonds_b_p, A2B, B2A, rev_odd, rev_even, pool,
                Wi_a, Wi_b, W_h, Wo_a, Wo_m, b_o):
    NAp, FAp = f_atoms_p.shape
    NBp, FBp = f_bonds_b_p.shape
    Hp = W_h.shape[0]
    nmolp = pool.shape[0]

    flops = 2 * (NAp * FAp * Hp + NBp * NAp * Hp + NBp * FBp * Hp
                 + (DEPTH - 1) * (NAp * NBp * Hp + NBp * NAp * Hp + NBp * Hp * Hp)
                 + NAp * NBp * Hp + NAp * FAp * Hp + NAp * Hp * Hp + nmolp * NAp * Hp)
    args = (f_atoms_p, f_bonds_b_p, A2B, B2A, rev_odd, rev_even, pool,
            Wi_a, Wi_b, W_h, Wo_a, Wo_m, b_o)
    bytes_accessed = sum(int(np.prod(a.shape)) * a.dtype.itemsize for a in args) \
        + nmolp * Hp * 4

    return pl.pallas_call(
        _mpn_fused_kernel,
        out_shape=jax.ShapeDtypeStruct((nmolp, Hp), jnp.float32),
        in_specs=[_VMEM] * len(args),
        out_specs=_VMEM,
        compiler_params=pltpu.CompilerParams(vmem_limit_bytes=32 * 1024 * 1024),
        cost_estimate=pl.CostEstimate(flops=flops, transcendentals=0,
                                      bytes_accessed=bytes_accessed),
    )(*args)


# ====================== synthetic BatchMolGraph glue ======================

def build_batch_graph(mol_sizes, key):
    """Mimics MolGraph/BatchMolGraph for synthetic chain molecules."""
    n_atoms, n_bonds = 1, 1
    f_atoms = [np.zeros(ATOM_FDIM, np.float32)]
    f_bonds = [np.zeros(BOND_INPUT_FDIM, np.float32)]
    a2b = [[]]
    b2a = [0]
    b2revb = [0]
    a_scope = []
    for n in mol_sizes:
        key, k_a, k_b = jax.random.split(key, 3)
        fa = np.asarray(jax.random.bernoulli(k_a, 0.3, (n, ATOM_FDIM)), np.float32)
        fb_und = np.asarray(jax.random.bernoulli(k_b, 0.5, (max(n - 1, 1), BOND_FDIM)), np.float32)
        mol_a2b = [[] for _ in range(n)]
        mol_b2a, mol_b2revb, mol_fbonds = [], [], []
        nb = 0
        for a1 in range(n - 1):               # chain topology a1 - a1+1
            a2 = a1 + 1
            fb = fb_und[a1]
            mol_fbonds.append(np.concatenate([fa[a1], fb]))
            mol_fbonds.append(np.concatenate([fa[a2], fb]))
            b1, b2 = nb, nb + 1
            mol_a2b[a2].append(b1); mol_b2a.append(a1)
            mol_a2b[a1].append(b2); mol_b2a.append(a2)
            mol_b2revb.append(b2); mol_b2revb.append(b1)
            nb += 2
        f_atoms.extend(list(fa))
        f_bonds.extend(mol_fbonds)
        for a in range(n):
            a2b.append([b + n_bonds for b in mol_a2b[a]])
        for b in range(nb):
            b2a.append(n_atoms + mol_b2a[b])
            b2revb.append(n_bonds + mol_b2revb[b])
        a_scope.append((n_atoms, n))
        n_atoms += n
        n_bonds += nb
    max_nb = max(len(x) for x in a2b)
    a2b_arr = np.array([a2b[a] + [0] * (max_nb - len(a2b[a])) for a in range(n_atoms)],
                       np.int32)
    return (np.stack(f_atoms), np.stack(f_bonds), a2b_arr,
            np.array(b2a, np.int32), np.array(b2revb, np.int32), a_scope)


def build_structure(a2b, b2a, b2revb, a_scope, NA, NB, nap, nbp, nmolp):
    """Factored dense operators for the graph scatter/gather (no O(NB^2) matrix)."""
    A2B = np.zeros((nap, nbp), np.float32)
    for a in range(NA):
        for b in a2b[a]:
            if b != 0:                 # 0 is the padding bond; message row 0 is always zero
                A2B[a, b] += 1.0
    B2A = np.zeros((nbp, nap), np.float32)
    B2A[np.arange(NB), b2a] = 1.0      # padded bond rows stay all-zero
    # chemprop always emits bonds in (b, b+1) reverse pairs starting at index 1
    # TODO(synk): fall back to a general permutation gather if this invariant ever breaks.
    for b in range(1, NB):
        expect = b + 1 if (b % 2 == 1) else b - 1
        assert int(b2revb[b]) == expect
    rev_odd = np.zeros((nbp, 1), np.float32)
    rev_even = np.zeros((nbp, 1), np.float32)
    rev_odd[1:NB:2] = 1.0
    rev_even[2:NB:2] = 1.0
    pool = np.zeros((nmolp, nap), np.float32)
    for i, (start, size) in enumerate(a_scope):
        pool[i, start:start + size] = 1.0 / size
    return A2B, B2A, rev_odd, rev_even, pool


def _pad2(x, rows, cols):
    x = np.asarray(x, np.float32)
    out = np.zeros((rows, cols), np.float32)
    out[:x.shape[0], :x.shape[1]] = x
    return out


def init_params(key):
    k1, k2, k3, k4 = jax.random.split(key, 4)
    W_i = jax.random.normal(k1, (BOND_INPUT_FDIM, HIDDEN), jnp.float32) / np.sqrt(BOND_INPUT_FDIM)
    W_h = jax.random.normal(k2, (HIDDEN, HIDDEN), jnp.float32) / np.sqrt(HIDDEN)
    W_o = jax.random.normal(k3, (ATOM_FDIM + HIDDEN, HIDDEN), jnp.float32) / np.sqrt(ATOM_FDIM + HIDDEN)
    b_o = jax.random.normal(k4, (HIDDEN,), jnp.float32) * 0.01
    return W_i, W_h, W_o, b_o


# ------------------- pure-JAX reference (torch semantics) -------------------

def ref_forward(f_atoms, f_bonds, a2b, b2a, b2revb, a_scope, W_i, W_h, W_o, b_o, depth):
    inp = f_bonds @ W_i
    message = jax.nn.relu(inp)
    for _ in range(depth - 1):
        nei = message[a2b]                       # [n_atoms, max_nb, H]
        a_msg = nei.sum(axis=1)
        rev = message[b2revb]
        message = a_msg[b2a] - rev
        message = message @ W_h
        message = jax.nn.relu(inp + message)
    nei = message[a2b]
    a_msg = nei.sum(axis=1)
    a_input = jnp.concatenate([f_atoms, a_msg], axis=1)
    atom_h = jax.nn.relu(a_input @ W_o + b_o)
    vecs = [atom_h[s:s + n].sum(axis=0) / n for (s, n) in a_scope]
    return jnp.stack(vecs)


if __name__ == "__main__":
    key = jax.random.PRNGKey(0)
    k_graph, k_param = jax.random.split(key)

    # 2 molecules: chains of 5 and 4 atoms -> n_atoms=10, n_bonds=15 (incl. padding row 0)
    f_atoms, f_bonds, a2b, b2a, b2revb, a_scope = build_batch_graph([5, 4], k_graph)
    NA, NB = f_atoms.shape[0], f_bonds.shape[0]
    nmol = len(a_scope)

    # lane-dense padded sizes
    NAp = _round_up(NA, LANE)
    NBp = _round_up(NB, LANE)
    FAp = _round_up(ATOM_FDIM, LANE)       # 256
    FBp = _round_up(BOND_FDIM, LANE)       # 128
    Hp = _round_up(HIDDEN, LANE)           # 128
    nmolp = _round_up(nmol, 8)

    A2B, B2A, rev_odd, rev_even, pool = build_structure(
        a2b, b2a, b2revb, a_scope, NA, NB, NAp, NBp, nmolp)

    W_i, W_h, W_o, b_o = init_params(k_param)

    f_atoms_p = _pad2(f_atoms, NAp, FAp)
    f_bonds_b_p = _pad2(f_bonds[:, ATOM_FDIM:], NBp, FBp)     # bond-only features

    Wi_a = _pad2(np.asarray(W_i)[:ATOM_FDIM], FAp, Hp)
    Wi_b = _pad2(np.asarray(W_i)[ATOM_FDIM:], FBp, Hp)
    W_h_p = _pad2(np.asarray(W_h), Hp, Hp)
    Wo_a = _pad2(np.asarray(W_o)[:ATOM_FDIM], FAp, Hp)
    Wo_m = _pad2(np.asarray(W_o)[ATOM_FDIM:], Hp, Hp)
    b_o_p = _pad2(np.asarray(b_o).reshape(1, -1), 1, Hp)

    out_p = mpn_forward(
        jnp.asarray(f_atoms_p), jnp.asarray(f_bonds_b_p),
        jnp.asarray(A2B, dtype=jnp.bfloat16),       # {0,1} exact in bf16: half the bytes
        jnp.asarray(B2A, dtype=jnp.bfloat16),
        jnp.asarray(rev_odd), jnp.asarray(rev_even),
        jnp.asarray(pool),
        jnp.asarray(Wi_a), jnp.asarray(Wi_b), jnp.asarray(W_h_p),
        jnp.asarray(Wo_a), jnp.asarray(Wo_m), jnp.asarray(b_o_p))
    out_p = jax.block_until_ready(out_p)
    out = np.asarray(out_p)[:nmol, :HIDDEN]

    ref = ref_forward(jnp.asarray(f_atoms), jnp.asarray(f_bonds),
                      jnp.asarray(a2b), jnp.asarray(b2a), jnp.asarray(b2revb),
                      a_scope, W_i, W_h, W_o, b_o, DEPTH)

    assert out.shape == (nmol, HIDDEN)
    err = float(np.abs(out - np.asarray(ref)).max())
    assert np.allclose(out, np.asarray(ref), rtol=1e-4, atol=1e-4), err
    print("KERNEL_OK")
</pallas_src>

<mosaic_0001>
module attributes {stable_mosaic.version = 11 : i64} {
  func.func @_mpn_fused_kernel(%arg0: memref<128x256xf32, #tpu.memory_space<vmem>>, %arg1: memref<128x128xf32, #tpu.memory_space<vmem>>, %arg2: memref<128x128xbf16, #tpu.memory_space<vmem>>, %arg3: memref<128x128xbf16, #tpu.memory_space<vmem>>, %arg4: memref<128x1xf32, #tpu.memory_space<vmem>>, %arg5: memref<128x1xf32, #tpu.memory_space<vmem>>, %arg6: memref<8x128xf32, #tpu.memory_space<vmem>>, %arg7: memref<256x128xf32, #tpu.memory_space<vmem>>, %arg8: memref<128x128xf32, #tpu.memory_space<vmem>>, %arg9: memref<128x128xf32, #tpu.memory_space<vmem>>, %arg10: memref<256x128xf32, #tpu.memory_space<vmem>>, %arg11: memref<128x128xf32, #tpu.memory_space<vmem>>, %arg12: memref<1x128xf32, #tpu.memory_space<vmem>>, %arg13: memref<8x128xf32, #tpu.memory_space<vmem>>) attributes {dimension_semantics = [], scalar_prefetch = 0 : i64, scratch_operands = 0 : i64, tpu.core_type = #tpu.core_type<tc>} {
    %c0 = arith.constant 0 : index
    %c0_0 = arith.constant 0 : index
    %0 = vector.load %arg0[%c0, %c0_0] : memref<128x256xf32, #tpu.memory_space<vmem>>, vector<128x256xf32>
    %c0_1 = arith.constant 0 : index
    %c0_2 = arith.constant 0 : index
    %1 = vector.load %arg2[%c0_1, %c0_2] : memref<128x128xbf16, #tpu.memory_space<vmem>>, vector<128x128xbf16>
    %2 = arith.extf %1 : vector<128x128xbf16> to vector<128x128xf32>
    %c0_3 = arith.constant 0 : index
    %c0_4 = arith.constant 0 : index
    %3 = vector.load %arg3[%c0_3, %c0_4] : memref<128x128xbf16, #tpu.memory_space<vmem>>, vector<128x128xbf16>
    %4 = arith.extf %3 : vector<128x128xbf16> to vector<128x128xf32>
    %c0_5 = arith.constant 0 : index
    %c0_6 = arith.constant 0 : index
    %5 = vector.load %arg9[%c0_5, %c0_6] : memref<128x128xf32, #tpu.memory_space<vmem>>, vector<128x128xf32>
    %c0_7 = arith.constant 0 : index
    %c0_8 = arith.constant 0 : index
    %6 = vector.load %arg4[%c0_7, %c0_8] : memref<128x1xf32, #tpu.memory_space<vmem>>, vector<128x1xf32>
    %c0_9 = arith.constant 0 : index
    %c0_10 = arith.constant 0 : index
    %7 = vector.load %arg5[%c0_9, %c0_10] : memref<128x1xf32, #tpu.memory_space<vmem>>, vector<128x1xf32>
    %c0_11 = arith.constant 0 : index
    %c0_12 = arith.constant 0 : index
    %8 = vector.load %arg7[%c0_11, %c0_12] : memref<256x128xf32, #tpu.memory_space<vmem>>, vector<256x128xf32>
    %cst = arith.constant dense<0.000000e+00> : vector<128x128xf32>
    %9 = tpu.matmul %0, %8, %cst {dimension_numbers = #tpu.dot_dimension_numbers<[1], [0], [0], [1], [0, 0, 1, 1], [], []>} : vector<128x256xf32>, vector<256x128xf32>, vector<128x128xf32> -> vector<128x128xf32>
    %cst_13 = arith.constant dense<0.000000e+00> : vector<128x128xf32>
    %10 = tpu.matmul %4, %9, %cst_13 {dimension_numbers = #tpu.dot_dimension_numbers<[1], [0], [0], [1], [0, 0, 1, 1], [], []>} : vector<128x128xf32>, vector<128x128xf32>, vector<128x128xf32> -> vector<128x128xf32>
    %c0_14 = arith.constant 0 : index
    %c0_15 = arith.constant 0 : index
    %11 = vector.load %arg1[%c0_14, %c0_15] : memref<128x128xf32, #tpu.memory_space<vmem>>, vector<128x128xf32>
    %c0_16 = arith.constant 0 : index
    %c0_17 = arith.constant 0 : index
    %12 = vector.load %arg8[%c0_16, %c0_17] : memref<128x128xf32, #tpu.memory_space<vmem>>, vector<128x128xf32>
    %cst_18 = arith.constant dense<0.000000e+00> : vector<128x128xf32>
    %13 = tpu.matmul %11, %12, %cst_18 {dimension_numbers = #tpu.dot_dimension_numbers<[1], [0], [0], [1], [0, 0, 1, 1], [], []>} : vector<128x128xf32>, vector<128x128xf32>, vector<128x128xf32> -> vector<128x128xf32>
    %14 = arith.addf %10, %13 : vector<128x128xf32>
    %cst_19 = arith.constant 0.000000e+00 : f32
    %15 = vector.broadcast %cst_19 : f32 to vector<128x128xf32>
    %16 = arith.maximumf %14, %15 : vector<128x128xf32>
    %cst_20 = arith.constant dense<0.000000e+00> : vector<128x128xf32>
    %17 = tpu.matmul %2, %16, %cst_20 {dimension_numbers = #tpu.dot_dimension_numbers<[1], [0], [0], [1], [0, 0, 1, 1], [], []>} : vector<128x128xf32>, vector<128x128xf32>, vector<128x128xf32> -> vector<128x128xf32>
    %cst_21 = arith.constant dense<0.000000e+00> : vector<128x128xf32>
    %18 = tpu.matmul %4, %17, %cst_21 {dimension_numbers = #tpu.dot_dimension_numbers<[1], [0], [0], [1], [0, 0, 1, 1], [], []>} : vector<128x128xf32>, vector<128x128xf32>, vector<128x128xf32> -> vector<128x128xf32>
    %c127_i32 = arith.constant 127 : i32
    %19 = tpu.dynamic_rotate %16 by %c127_i32 dim 0 : vector<128x128xf32>, i32 -> vector<128x128xf32>
    %20 = vector.broadcast %6 : vector<128x1xf32> to vector<128x128xf32>
    %21 = arith.mulf %20, %19 : vector<128x128xf32>
    %c1_i32 = arith.constant 1 : i32
    %22 = tpu.dynamic_rotate %16 by %c1_i32 dim 0 : vector<128x128xf32>, i32 -> vector<128x128xf32>
    %23 = vector.broadcast %7 : vector<128x1xf32> to vector<128x128xf32>
    %24 = arith.mulf %23, %22 : vector<128x128xf32>
    %25 = arith.addf %21, %24 : vector<128x128xf32>
    %26 = arith.subf %18, %25 : vector<128x128xf32>
    %cst_22 = arith.constant dense<0.000000e+00> : vector<128x128xf32>
    %27 = tpu.matmul %26, %5, %cst_22 {dimension_numbers = #tpu.dot_dimension_numbers<[1], [0], [0], [1], [0, 0, 1, 1], [], []>} : vector<128x128xf32>, vector<128x128xf32>, vector<128x128xf32> -> vector<128x128xf32>
    %28 = arith.addf %14, %27 : vector<128x128xf32>
    %cst_23 = arith.constant 0.000000e+00 : f32
    %29 = vector.broadcast %cst_23 : f32 to vector<128x128xf32>
    %30 = arith.maximumf %28, %29 : vector<128x128xf32>
    %cst_24 = arith.constant dense<0.000000e+00> : vector<128x128xf32>
    %31 = tpu.matmul %2, %30, %cst_24 {dimension_numbers = #tpu.dot_dimension_numbers<[1], [0], [0], [1], [0, 0, 1, 1], [], []>} : vector<128x128xf32>, vector<128x128xf32>, vector<128x128xf32> -> vector<128x128xf32>
    %cst_25 = arith.constant dense<0.000000e+00> : vector<128x128xf32>
    %32 = tpu.matmul %4, %31, %cst_25 {dimension_numbers = #tpu.dot_dimension_numbers<[1], [0], [0], [1], [0, 0, 1, 1], [], []>} : vector<128x128xf32>, vector<128x128xf32>, vector<128x128xf32> -> vector<128x128xf32>
    %c127_i32_26 = arith.constant 127 : i32
    %33 = tpu.dynamic_rotate %30 by %c127_i32_26 dim 0 : vector<128x128xf32>, i32 -> vector<128x128xf32>
    %34 = vector.broadcast %6 : vector<128x1xf32> to vector<128x128xf32>
    %35 = arith.mulf %34, %33 : vector<128x128xf32>
    %c1_i32_27 = arith.constant 1 : i32
    %36 = tpu.dynamic_rotate %30 by %c1_i32_27 dim 0 : vector<128x128xf32>, i32 -> vector<128x128xf32>
    %37 = vector.broadcast %7 : vector<128x1xf32> to vector<128x128xf32>
    %38 = arith.mulf %37, %36 : vector<128x128xf32>
    %39 = arith.addf %35, %38 : vector<128x128xf32>
    %40 = arith.subf %32, %39 : vector<128x128xf32>
    %cst_28 = arith.constant dense<0.000000e+00> : vector<128x128xf32>
    %41 = tpu.matmul %40, %5, %cst_28 {dimension_numbers = #tpu.dot_dimension_numbers<[1], [0], [0], [1], [0, 0, 1, 1], [], []>} : vector<128x128xf32>, vector<128x128xf32>, vector<128x128xf32> -> vector<128x128xf32>
    %42 = arith.addf %14, %41 : vector<128x128xf32>
    %cst_29 = arith.constant 0.000000e+00 : f32
    %43 = vector.broadcast %cst_29 : f32 to vector<128x128xf32>
    %44 = arith.maximumf %42, %43 : vector<128x128xf32>
    %cst_30 = arith.constant dense<0.000000e+00> : vector<128x128xf32>
    %45 = tpu.matmul %2, %44, %cst_30 {dimension_numbers = #tpu.dot_dimension_numbers<[1], [0], [0], [1], [0, 0, 1, 1], [], []>} : vector<128x128xf32>, vector<128x128xf32>, vector<128x128xf32> -> vector<128x128xf32>
    %c0_31 = arith.constant 0 : index
    %c0_32 = arith.constant 0 : index
    %46 = vector.load %arg10[%c0_31, %c0_32] : memref<256x128xf32, #tpu.memory_space<vmem>>, vector<256x128xf32>
    %cst_33 = arith.constant dense<0.000000e+00> : vector<128x128xf32>
    %47 = tpu.matmul %0, %46, %cst_33 {dimension_numbers = #tpu.dot_dimension_numbers<[1], [0], [0], [1], [0, 0, 1, 1], [], []>} : vector<128x256xf32>, vector<256x128xf32>, vector<128x128xf32> -> vector<128x128xf32>
    %c0_34 = arith.constant 0 : index
    %c0_35 = arith.constant 0 : index
    %48 = vector.load %arg11[%c0_34, %c0_35] : memref<128x128xf32, #tpu.memory_space<vmem>>, vector<128x128xf32>
    %cst_36 = arith.constant dense<0.000000e+00> : vector<128x128xf32>
    %49 = tpu.matmul %45, %48, %cst_36 {dimension_numbers = #tpu.dot_dimension_numbers<[1], [0], [0], [1], [0, 0, 1, 1], [], []>} : vector<128x128xf32>, vector<128x128xf32>, vector<128x128xf32> -> vector<128x128xf32>
    %50 = arith.addf %47, %49 : vector<128x128xf32>
    %c0_37 = arith.constant 0 : index
    %c0_38 = arith.constant 0 : index
    %51 = vector.load %arg12[%c0_37, %c0_38] : memref<1x128xf32, #tpu.memory_space<vmem>>, vector<1x128xf32>
    %52 = vector.broadcast %51 : vector<1x128xf32> to vector<128x128xf32>
    %53 = arith.addf %50, %52 : vector<128x128xf32>
    %cst_39 = arith.constant 0.000000e+00 : f32
    %54 = vector.broadcast %cst_39 : f32 to vector<128x128xf32>
    %55 = arith.maximumf %53, %54 : vector<128x128xf32>
    %c0_40 = arith.constant 0 : index
    %c0_41 = arith.constant 0 : index
    %56 = vector.load %arg6[%c0_40, %c0_41] : memref<8x128xf32, #tpu.memory_space<vmem>>, vector<8x128xf32>
    %cst_42 = arith.constant dense<0.000000e+00> : vector<8x128xf32>
    %57 = tpu.matmul %56, %55, %cst_42 {dimension_numbers = #tpu.dot_dimension_numbers<[1], [0], [0], [1], [0, 0, 1, 1], [], []>} : vector<8x128xf32>, vector<128x128xf32>, vector<8x128xf32> -> vector<8x128xf32>
    %c0_43 = arith.constant 0 : index
    %c0_44 = arith.constant 0 : index
    %58 = vector.load %arg13[%c0_43, %c0_44] : memref<8x128xf32, #tpu.memory_space<vmem>>, vector<8x128xf32>
    tpu.vector_store %arg13[%c0_43, %c0_44], %57 {strides = array<i32>} : memref<8x128xf32, #tpu.memory_space<vmem>>, vector<8x128xf32>,
    return
  }
}

</mosaic_0001>

<bundles_post_ra>
// kernel: mpn_forward.1
= control target key start
LH: loop header
LB: loop body
LE: loop exit
PB: predicated region body
PF: predicated region fallthrough
CT: control target
= control target key end

     0   :  { %18 = vsyncpa [#allocation3], 0  ;;  %s3605_s0 = inlined_call_operand.vmem [shape: f32[128,256], index: 0, kind: input, shape index: {}]   ;;  %s3606_s1 = inlined_call_operand.hbm [shape: f32[128,128], index: 1, kind: input, shape index: {}]   ;;  %s3607_s2 = inlined_call_operand.hbm [shape: bf16[128,128], index: 2, kind: input, shape index: {}]   ;;  %s3608_s3 = inlined_call_operand.hbm [shape: bf16[128,128], index: 3, kind: input, shape index: {}]   ;;  %s3609_s4 = inlined_call_operand.vmem [shape: f32[128,1], index: 4, kind: input, shape index: {}]   ;;  %s3610_s5 = inlined_call_operand.vmem [shape: f32[128,1], index: 5, kind: input, shape index: {}]   ;;  %s3611_s6 = inlined_call_operand.hbm [shape: f32[8,128], index: 6, kind: input, shape index: {}]   ;;  %s3612_s7 = inlined_call_operand.hbm [shape: f32[256,128], index: 7, kind: input, shape index: {}]   ;;  %s3613_s8 = inlined_call_operand.hbm [shape: f32[128,128], index: 8, kind: input, shape index: {}]   ;;  %s3614_s9 = inlined_call_operand.hbm [shape: f32[128,128], index: 9, kind: input, shape index: {}]   ;;  %s3615_s10 = inlined_call_operand.hbm [shape: f32[256,128], index: 10, kind: input, shape index: {}]   ;;  %s3616_s11 = inlined_call_operand.hbm [shape: f32[128,128], index: 11, kind: input, shape index: {}]   ;;  %s3617_s12 = inlined_call_operand.vmem [shape: f32[1,128], index: 12, kind: input, shape index: {}]   ;;  %s3618_s13 = inlined_call_operand.hbm [shape: f32[8,128], index: 13, kind: output, shape index: {}]  }
   0x1   :  { %19 = vsyncpa [#allocation6], 0 }
   0x2   :  { %20 = vsyncpa [#allocation9], 0 }
   0x3   :  { %21 = vsyncpa [#allocation12], 0 }
   0x4   :  { %22 = vsyncpa [#allocation15], 0  ;;  %s43_s27 = sshll.u32 %s3607_s2, 4  ;;  %s44_s27 = int_to_ptr.hbm [resolvable:$true] %s43_s27 }
   0x5   :  { %23 = vsyncpa [#allocation4], 0  ;;  %s2341_s28 = smov [#allocation5]   ;;  %s74_s15 = sshll.u32 %s3611_s6, 4  ;;  %s75_s15 = int_to_ptr.hbm [resolvable:$true] %s74_s15 }
   0x6   :  { %s45_s29 = sshll.u32 %s2341_s28, 4  ;;  %s2342_s16 = smov 64   ;;  %s46_s29 = int_to_ptr.vmem [resolvable:$true] %s45_s29 }
   0x7   :  { %s2343_s17 = smov 4   ;;  %s2344_s18 = smov [#allocation8]  }
   0x8   :  { %51 = dma.hbm_to_vmem [thread:$0]  %s44_s27, 1024, %s46_s29, [#allocation6], %s2342_s16, %s2342_s16, %s2343_s17  }
   0x9   :  { %s76_s19 = sshll.u32 %s2344_s18, 4  ;;  %s97_s21 = sshll.u32 %s3613_s8, 4  ;;  %s77_s19 = int_to_ptr.vmem [resolvable:$true] %s76_s19  ;;  %s98_s21 = int_to_ptr.hbm [resolvable:$true] %s97_s21 }
   0xa   :  { %79 = dma.hbm_to_vmem [thread:$0]  %s75_s15, 128, %s77_s19, [#allocation9]  }
   0xb   :  { %s2345_s22 = smov [#allocation11]   ;;  %s123_s25 = sshll.u32 %s3615_s10, 4  ;;  %s124_s25 = int_to_ptr.hbm [resolvable:$true] %s123_s25 }
   0xc   :  { %s99_s23 = sshll.u32 %s2345_s22, 4  ;;  %s2346_s26 = smov 128   ;;  %s100_s23 = int_to_ptr.vmem [resolvable:$true] %s99_s23 }
   0xd   :  { %s2347_s28 = smov 8   ;;  %s2348_s27 = smov [#allocation14]  }
   0xe   :  { %105 = dma.hbm_to_vmem [thread:$0]  %s98_s21, 2048, %s100_s23, [#allocation12], %s2346_s26, %s2346_s26, %s2347_s28  }
   0xf   :  { %s125_s29 = sshll.u32 %s2348_s27, 4  ;;  %s30_s8 = sshll.u32 %s3606_s1, 4  ;;  %s126_s29 = int_to_ptr.vmem [resolvable:$true] %s125_s29  ;;  %s31_s8 = int_to_ptr.hbm [resolvable:$true] %s30_s8 }
  0x10   :  { %131 = dma.hbm_to_vmem [thread:$0]  %s124_s25, 4096, %s126_s29, [#allocation15], %s2346_s26, %s2346_s26, %s2347_s28  }
  0x11   :  { %s56_s18 = sshll.u32 %s3608_s3, 4  ;;  %s2349_s19 = smov [#allocation2]   ;;  %s57_s18 = int_to_ptr.hbm [resolvable:$true] %s56_s18 }
  0x12   :  { %s32_s2 = sshll.u32 %s2349_s19, 4  ;;  %s2350_s20 = smov [#allocation7]   ;;  %s33_s2 = int_to_ptr.vmem [resolvable:$true] %s32_s2 }
  0x13   :  { %38 = dma.hbm_to_vmem [thread:$0]  %s31_s8, 2048, %s33_s2, [#allocation3], %s2346_s26, %s2346_s26, %s2347_s28  }
  0x14   :  { %s58_s1 = sshll.u32 %s2350_s20, 4  ;;  %s84_s23 = sshll.u32 %s3612_s7, 4  ;;  %s59_s1 = int_to_ptr.vmem [resolvable:$true] %s58_s1  ;;  %s85_s23 = int_to_ptr.hbm [resolvable:$true] %s84_s23 }
  0x15   :  { %64 = dma.hbm_to_vmem [thread:$0]  %s57_s18, 1024, %s59_s1, [#allocation6], %s2342_s16, %s2342_s16, %s2343_s17  }
  0x16   :  { %s110_s24 = sshll.u32 %s3614_s9, 4  ;;  %s2351_s25 = smov [#allocation10]   ;;  %s111_s24 = int_to_ptr.hbm [resolvable:$true] %s110_s24 }
  0x17   :  { %s86_s27 = sshll.u32 %s2351_s25, 4  ;;  %s2352_s29 = smov [#allocation13]   ;;  %s87_s27 = int_to_ptr.vmem [resolvable:$true] %s86_s27 }
  0x18   :  { %92 = dma.hbm_to_vmem [thread:$0]  %s85_s23, 4096, %s87_s27, [#allocation9], %s2346_s26, %s2346_s26, %s2347_s28  }
  0x19   :  { %s112_s7 = sshll.u32 %s2352_s29, 4  ;;  %s136_s8 = sshll.u32 %s3616_s11, 4  ;;  %s113_s7 = int_to_ptr.vmem [resolvable:$true] %s112_s7  ;;  %s137_s8 = int_to_ptr.hbm [resolvable:$true] %s136_s8 }
  0x1a   :  { %118 = dma.hbm_to_vmem [thread:$0]  %s111_s24, 2048, %s113_s7, [#allocation12], %s2346_s26, %s2346_s26, %s2347_s28  }
  0x1b   :  { %s2353_s9 = smov [#allocation16]  }
  0x1c   :  { %s138_s16 = sshll.u32 %s2353_s9, 4  ;;  %s139_s16 = int_to_ptr.vmem [resolvable:$true] %s138_s16 }
  0x1d   :  { %144 = dma.hbm_to_vmem [thread:$0]  %s137_s8, 2048, %s139_s16, [#allocation15], %s2346_s26, %s2346_s26, %s2347_s28  }
  0x1e   :  { %2329 = dma.done.wait [#allocation3], 2048  }
  0x1f   :  { %2330 = vsyncadd [#allocation3], 4294965248 }
  0x20   :  { %2331 = dma.done.wait [#allocation6], 2048  }
  0x21   :  { %2332 = vsyncadd [#allocation6], 4294965248 }
  0x22   :  { %2333 = dma.done.wait [#allocation9], 4224  }
  0x23   :  { %2334 = vsyncadd [#allocation9], 4294963072 }
  0x24   :  { %2335 = dma.done.wait [#allocation12], 4096  }
  0x25   :  { %2336 = vsyncadd [#allocation12], 4294963200 }
  0x26   :  { %2337 = dma.done.wait [#allocation15], 6144  }
  0x27   :  { %2338 = vsyncadd [#allocation15], 4294961152  ;;  %v342_v0 = vld [vmem:[#allocation10 + $0x78] sm:$0xff]  ;;  %v341_v2 = vld [vmem:[#allocation10 + $0x70] sm:$0xff]  ;;  %s1914_s2 = sshll.u32 %s3618_s13, 4  ;;  %s1915_s2 = int_to_ptr.hbm [resolvable:$true] %s1914_s2 }
  0x28   :  { %v358_v1 = vld [vmem:[#allocation10 + $0xf8] sm:$0xff]  ;;  %2006 = vmatpush.msra.mxu3 %v342_v0  ;;  %v357_v3 = vld [vmem:[#allocation10 + $0xf0] sm:$0xff]  ;;  %359 = vmatpush.msra.mxu0 %v342_v0  ;;  %v340_v4 = vld [vmem:[#allocation10 + $0x68] sm:$0xff] }
  0x29   :  { %2022 = vmatpush.msra.mxu2 %v358_v1  ;;  %424 = vmatpush.msra.mxu1 %v358_v1  ;;  %v356_v5 = vld [vmem:[#allocation10 + $0xe8] sm:$0xff]  ;;  %v339_v6 = vld [vmem:[#allocation10 + $0x60] sm:$0xff]  ;;  %v338_v8 = vld [vmem:[#allocation10 + $0x58] sm:$0xff] }
  0x2a   :  { %2007 = vmatpush.msra.mxu3 %v341_v2  ;;  %360 = vmatpush.msra.mxu0 %v341_v2  ;;  %v355_v7 = vld [vmem:[#allocation10 + $0xe0] sm:$0xff]  ;;  %v354_v9 = vld [vmem:[#allocation10 + $0xd8] sm:$0xff]  ;;  %v337_v10 = vld [vmem:[#allocation10 + $0x50] sm:$0xff] }
  0x2b   :  { %2023 = vmatpush.msra.mxu2 %v357_v3  ;;  %425 = vmatpush.msra.mxu1 %v357_v3  ;;  %v353_v11 = vld [vmem:[#allocation10 + $0xd0] sm:$0xff]  ;;  %v336_v12 = vld [vmem:[#allocation10 + $0x48] sm:$0xff]  ;;  %v335_v14 = vld [vmem:[#allocation10 + $0x40] sm:$0xff] }
  0x2c   :  { %2008 = vmatpush.msra.mxu3 %v340_v4  ;;  %361 = vmatpush.msra.mxu0 %v340_v4  ;;  %v352_v13 = vld [vmem:[#allocation10 + $0xc8] sm:$0xff]  ;;  %v351_v15 = vld [vmem:[#allocation10 + $0xc0] sm:$0xff]  ;;  %v334_v16 = vld [vmem:[#allocation10 + $0x38] sm:$0xff] }
  0x2d   :  { %2024 = vmatpush.msra.mxu2 %v356_v5  ;;  %426 = vmatpush.msra.mxu1 %v356_v5  ;;  %v350_v17 = vld [vmem:[#allocation10 + $0xb8] sm:$0xff]  ;;  %v333_v18 = vld [vmem:[#allocation10 + $0x30] sm:$0xff]  ;;  %v332_v20 = vld [vmem:[#allocation10 + $0x28] sm:$0xff] }
  0x2e   :  { %2009 = vmatpush.msra.mxu3 %v339_v6  ;;  %362 = vmatpush.msra.mxu0 %v339_v6  ;;  %v349_v19 = vld [vmem:[#allocation10 + $0xb0] sm:$0xff]  ;;  %v348_v21 = vld [vmem:[#allocation10 + $0xa8] sm:$0xff]  ;;  %v331_v22 = vld [vmem:[#allocation10 + $0x20] sm:$0xff] }
  0x2f   :  { %2025 = vmatpush.msra.mxu2 %v355_v7  ;;  %427 = vmatpush.msra.mxu1 %v355_v7  ;;  %v347_v23 = vld [vmem:[#allocation10 + $0xa0] sm:$0xff]  ;;  %v330_v24 = vld [vmem:[#allocation10 + $0x18] sm:$0xff]  ;;  %v329_v26 = vld [vmem:[#allocation10 + $0x10] sm:$0xff] }
  0x30   :  { %2010 = vmatpush.msra.mxu3 %v338_v8  ;;  %363 = vmatpush.msra.mxu0 %v338_v8  ;;  %v346_v25 = vld [vmem:[#allocation10 + $0x98] sm:$0xff]  ;;  %v345_v27 = vld [vmem:[#allocation10 + $0x90] sm:$0xff]  ;;  %v328_v28 = vld [vmem:[#allocation10 + $0x8] sm:$0xff] }
  0x31   :  { %2026 = vmatpush.msra.mxu2 %v354_v9  ;;  %428 = vmatpush.msra.mxu1 %v354_v9  ;;  %v344_v29 = vld [vmem:[#allocation10 + $0x88] sm:$0xff]  ;;  %v327_v30 = vld [vmem:[#allocation10] sm:$0xff]  ;;  %v202_v33 = vld [vmem:[%s3605_s0 + $0x98] sm:$0xff] }
  0x32   :  { %2011 = vmatpush.msra.mxu3 %v337_v10  ;;  %364 = vmatpush.msra.mxu0 %v337_v10  ;;  %v343_v31 = vld [vmem:[#allocation10 + $0x80] sm:$0xff]  ;;  %v201_v32 = vld [vmem:[%s3605_s0 + $0x90] sm:$0xff]  ;;  %v183_v34 = vld [vmem:[%s3605_s0] sm:$0xff] }
  0x33   :  { %2027 = vmatpush.msra.mxu2 %v353_v11  ;;  %429 = vmatpush.msra.mxu1 %v353_v11  ;;  %v184_v35 = vld [vmem:[%s3605_s0 + $0x8] sm:$0xff]  ;;  %v203_v36 = vld [vmem:[%s3605_s0 + $0xa0] sm:$0xff]  ;;  %v185_v38 = vld [vmem:[%s3605_s0 + $0x10] sm:$0xff] }
  0x34   :  { %2012 = vmatpush.msra.mxu3 %v336_v12  ;;  %365 = vmatpush.msra.mxu0 %v336_v12  ;;  %v204_v37 = vld [vmem:[%s3605_s0 + $0xa8] sm:$0xff]  ;;  %v186_v39 = vld [vmem:[%s3605_s0 + $0x18] sm:$0xff]  ;;  %v205_v40 = vld [vmem:[%s3605_s0 + $0xb0] sm:$0xff] }
  0x35   :  { %2028 = vmatpush.msra.mxu2 %v352_v13  ;;  %430 = vmatpush.msra.mxu1 %v352_v13  ;;  %v206_v41 = vld [vmem:[%s3605_s0 + $0xb8] sm:$0xff]  ;;  %v187_v42 = vld [vmem:[%s3605_s0 + $0x20] sm:$0xff]  ;;  %v188_v43 = vld [vmem:[%s3605_s0 + $0x28] sm:$0xff] }
  0x36   :  { %2013 = vmatpush.msra.mxu3 %v335_v14  ;;  %366 = vmatpush.msra.mxu0 %v335_v14  ;;  %v207_v44 = vld [vmem:[%s3605_s0 + $0xc0] sm:$0xff]  ;;  %v208_v45 = vld [vmem:[%s3605_s0 + $0xc8] sm:$0xff]  ;;  %v189_v46 = vld [vmem:[%s3605_s0 + $0x30] sm:$0xff] }
  0x37   :  { %2029 = vmatpush.msra.mxu2 %v351_v15  ;;  %431 = vmatpush.msra.mxu1 %v351_v15  ;;  %v190_v47 = vld [vmem:[%s3605_s0 + $0x38] sm:$0xff]  ;;  %v209_v48 = vld [vmem:[%s3605_s0 + $0xd0] sm:$0xff]  ;;  %v191_v50 = vld [vmem:[%s3605_s0 + $0x40] sm:$0xff] }
  0x38   :  { %2014 = vmatpush.msra.mxu3 %v334_v16  ;;  %367 = vmatpush.msra.mxu0 %v334_v16  ;;  %v210_v49 = vld [vmem:[%s3605_s0 + $0xd8] sm:$0xff]  ;;  %v192_v51 = vld [vmem:[%s3605_s0 + $0x48] sm:$0xff]  ;;  %v211_v52 = vld [vmem:[%s3605_s0 + $0xe0] sm:$0xff] }
  0x39   :  { %2030 = vmatpush.msra.mxu2 %v350_v17  ;;  %432 = vmatpush.msra.mxu1 %v350_v17  ;;  %v212_v53 = vld [vmem:[%s3605_s0 + $0xe8] sm:$0xff]  ;;  %v193_v54 = vld [vmem:[%s3605_s0 + $0x50] sm:$0xff]  ;;  %v194_v55 = vld [vmem:[%s3605_s0 + $0x58] sm:$0xff] }
  0x3a   :  { %2015 = vmatpush.msra.mxu3 %v333_v18  ;;  %368 = vmatpush.msra.mxu0 %v333_v18  ;;  %v213_v56 = vld [vmem:[%s3605_s0 + $0xf0] sm:$0xff]  ;;  %v214_v57 = vld [vmem:[%s3605_s0 + $0xf8] sm:$0xff]  ;;  %v195_v58 = vld [vmem:[%s3605_s0 + $0x60] sm:$0xff] }
  0x3b   :  { %2031 = vmatpush.msra.mxu2 %v349_v19  ;;  %433 = vmatpush.msra.mxu1 %v349_v19  ;;  %v196_v59 = vld [vmem:[%s3605_s0 + $0x68] sm:$0xff]  ;;  %v197_v60 = vld [vmem:[%s3605_s0 + $0x70] sm:$0xff]  ;;  %v198_v61 = vld [vmem:[%s3605_s0 + $0x78] sm:$0xff] }
  0x3c   :  { %2016 = vmatpush.msra.mxu3 %v332_v20  ;;  %369 = vmatpush.msra.mxu0 %v332_v20  ;;  %v199_v62 = vld [vmem:[%s3605_s0 + $0x80] sm:$0xff]  ;;  %v200_v63 = vld [vmem:[%s3605_s0 + $0x88] sm:$0xff]  ;;  %v519_v13 = vld [vmem:[#allocation11 + $0x70] sm:$0xff] }
  0x3d   :  { %2032 = vmatpush.msra.mxu2 %v348_v21  ;;  %434 = vmatpush.msra.mxu1 %v348_v21  ;;  %v520_v12 = vld [vmem:[#allocation11 + $0x78] sm:$0xff]  ;;  %v518_v16 = vld [vmem:[#allocation11 + $0x68] sm:$0xff]  ;;  %v517_v17 = vld [vmem:[#allocation11 + $0x60] sm:$0xff] }
  0x3e   :  { %2017 = vmatpush.msra.mxu3 %v331_v22  ;;  %370 = vmatpush.msra.mxu0 %v331_v22  ;;  %v516_v20 = vld [vmem:[#allocation11 + $0x58] sm:$0xff]  ;;  %v515_v21 = vld [vmem:[#allocation11 + $0x50] sm:$0xff] }
  0x3f   :  { %2033 = vmatpush.msra.mxu2 %v347_v23  ;;  %435 = vmatpush.msra.mxu1 %v347_v23 }
  0x40   :  { %2018 = vmatpush.msra.mxu3 %v330_v24  ;;  %371 = vmatpush.msra.mxu0 %v330_v24  ;;  %v514_v24 = vld [vmem:[#allocation11 + $0x48] sm:$0xff] }
  0x41   :  { %2034 = vmatpush.msra.mxu2 %v346_v25  ;;  %436 = vmatpush.msra.mxu1 %v346_v25  ;;  %v513_v25 = vld [vmem:[#allocation11 + $0x40] sm:$0xff] }
  0x42   :  { %2019 = vmatpush.msra.mxu3 %v329_v26  ;;  %372 = vmatpush.msra.mxu0 %v329_v26 }
  0x43   :  { %2035 = vmatpush.msra.mxu2 %v345_v27  ;;  %437 = vmatpush.msra.mxu1 %v345_v27 }
  0x44   :  { %2020 = vmatpush.msra.mxu3 %v328_v28  ;;  %373 = vmatpush.msra.mxu0 %v328_v28  ;;  %v512_v28 = vld [vmem:[#allocation11 + $0x38] sm:$0xff] }
  0x45   :  { %2036 = vmatpush.msra.mxu2 %v344_v29  ;;  %438 = vmatpush.msra.mxu1 %v344_v29  ;;  %v511_v29 = vld [vmem:[#allocation11 + $0x30] sm:$0xff] }
  0x46   :  { %2021 = vmatpush.msra.mxu3 %v327_v30  ;;  %374 = vmatpush.msra.mxu0 %v327_v30 }
  0x47   :  { %2037 = vmatpush.msra.mxu2 %v343_v31  ;;  %402 = vmatmul.f32.vlgmr.msra.gmra.mxu3 %v201_v32  ;;  %v510_v32 = vld [vmem:[#allocation11 + $0x28] sm:$0xff] }
  0x48   :  { %467 = vmatmul.f32.vlgmr.msra.gmra.mxu2 %v202_v33  ;;  %439 = vmatpush.msra.mxu1 %v343_v31  ;;  %v509_v33 = vld [vmem:[#allocation11 + $0x20] sm:$0xff] }
  0x49   :  { %375 = vmatmul.f32.vlgmr.msra.gmra.mxu0 %v183_v34  ;;  %440 = vmatmul.f32.vlgmr.msra.gmra.mxu1 %v184_v35 }
  0x4a   :  { %521 = vmatpush.msrb.mxu2 %v520_v12  ;;  %v1961_v12 = vld [vmem:[#allocation7] sm:$0xff]  }
  0x4c   :  { %522 = vmatpush.msrb.mxu2 %v519_v13 }
  0x4e   :  { %523 = vmatpush.msrb.mxu2 %v518_v16  ;;  %v493_v16 = vld [vmem:[#allocation2 + $0x20] sm:$0xff] }
  0x4f   :  { %405 = vmatmul.f32.gmra.mxu3 %v203_v36  ;;  %v508_v36 = vld [vmem:[#allocation11 + $0x18] sm:$0xff] }
  0x50   :  { %470 = vmatmul.f32.gmra.mxu2 %v204_v37  ;;  %v507_v37 = vld [vmem:[#allocation11 + $0x10] sm:$0xff] }
  0x51   :  { %378 = vmatmul.f32.gmra.mxu0 %v185_v38  ;;  %443 = vmatmul.f32.gmra.mxu1 %v186_v39 }
  0x52   :  { %524 = vmatpush.msrb.mxu2 %v517_v17  ;;  %v494_v17 = vld [vmem:[#allocation2 + $0x28] sm:$0xff] }
  0x54   :  { %525 = vmatpush.msrb.mxu2 %v516_v20  ;;  %v315_v20 = vld [vmem:[%s3610_s5 + $0x20] sm:$0xff] }
  0x56   :  { %526 = vmatpush.msrb.mxu2 %v515_v21 }
  0x57   :  { %408 = vmatmul.f32.gmra.mxu3 %v205_v40  ;;  %v506_v40 = vld [vmem:[#allocation11 + $0x8] sm:$0xff] }
  0x58   :  { %473 = vmatmul.f32.gmra.mxu2 %v206_v41  ;;  %v505_v41 = vld [vmem:[#allocation11] sm:$0xff] }
  0x59   :  { %381 = vmatmul.f32.gmra.mxu0 %v187_v42  ;;  %446 = vmatmul.f32.gmra.mxu1 %v188_v43 }
  0x5a   :  { %527 = vmatpush.msrb.mxu2 %v514_v24  ;;  %v300_v24 = vld [vmem:[%s3609_s4 + $0x28] sm:$0xff] }
  0x5c   :  { %528 = vmatpush.msrb.mxu2 %v513_v25  ;;  %v2000_v25 = vld [vmem:[#allocation7 + $0x10] sm:$0xff]  }
  0x5e   :  { %529 = vmatpush.msrb.mxu2 %v512_v28  ;;  %v317_v28 = vld [vmem:[%s3610_s5 + $0x30] sm:$0xff] }
  0x5f   :  { %411 = vmatmul.f32.gmra.mxu3 %v207_v44 }
  0x60   :  { %476 = vmatmul.f32.gmra.mxu2 %v208_v45  ;;  %v489_v45 = vld [vmem:[#allocation2] sm:$0xff] }
  0x61   :  { %384 = vmatmul.f32.gmra.mxu0 %v189_v46  ;;  %449 = vmatmul.f32.gmra.mxu1 %v190_v47 }
  0x62   :  { %530 = vmatpush.msrb.mxu2 %v511_v29  ;;  %v301_v29 = vld [vmem:[%s3609_s4 + $0x30] sm:$0xff] }
  0x64   :  { %531 = vmatpush.msrb.mxu2 %v510_v32  ;;  %v299_v32 = vld [vmem:[%s3609_s4 + $0x20] sm:$0xff] }
  0x66   :  { %532 = vmatpush.msrb.mxu2 %v509_v33  ;;  %v318_v33 = vld [vmem:[%s3610_s5 + $0x38] sm:$0xff] }
  0x67   :  { %414 = vmatmul.f32.gmra.mxu3 %v209_v48 }
  0x68   :  { %479 = vmatmul.f32.gmra.mxu2 %v210_v49 }
  0x69   :  { %387 = vmatmul.f32.gmra.mxu0 %v191_v50  ;;  %452 = vmatmul.f32.gmra.mxu1 %v192_v51  ;;  %v490_v51 = vld [vmem:[#allocation2 + $0x8] sm:$0xff] }
  0x6a   :  { %533 = vmatpush.msrb.mxu2 %v508_v36  ;;  %v499_v36 = vld [vmem:[#allocation2 + $0x50] sm:$0xff] }
  0x6c   :  { %534 = vmatpush.msrb.mxu2 %v507_v37  ;;  %v316_v37 = vld [vmem:[%s3610_s5 + $0x28] sm:$0xff] }
  0x6e   :  { %535 = vmatpush.msrb.mxu2 %v506_v40  ;;  %v500_v40 = vld [vmem:[#allocation2 + $0x58] sm:$0xff] }
  0x6f   :  { %417 = vmatmul.f32.gmra.mxu3 %v211_v52 }
  0x70   :  { %482 = vmatmul.f32.gmra.mxu2 %v212_v53 }
  0x71   :  { %390 = vmatmul.f32.gmra.mxu0 %v193_v54  ;;  %455 = vmatmul.f32.gmra.mxu1 %v194_v55 }
  0x72   :  { %536 = vmatpush.msrb.mxu2 %v505_v41  ;;  %v320_v41 = vld [vmem:[%s3610_s5 + $0x48] sm:$0xff] }
  0x77   :  { %420 = vmatmul.f32.gmra.mxu3 %v213_v56 }
  0x78   :  { %485 = vmatmul.f32.gmra.mxu2 %v214_v57 }
  0x79   :  { %393 = vmatmul.f32.gmra.mxu0 %v195_v58  ;;  %458 = vmatmul.f32.gmra.mxu1 %v196_v59  ;;  %v491_v58 = vld [vmem:[#allocation2 + $0x10] sm:$0xff] }
  0x80   :  { %537 = vmatmul.f32.vlgmr.msrb.gmra.mxu2 %v489_v45  ;;  %v501_v45 = vld [vmem:[#allocation2 + $0x60] sm:$0xff] }
  0x81   :  { %396 = vmatmul.f32.gmra.mxu0 %v197_v60  ;;  %461 = vmatmul.f32.gmra.mxu1 %v198_v61  ;;  %v296_v60 = vld [vmem:[%s3609_s4 + $0x8] sm:$0xff] }
  0x88   :  { %540 = vmatmul.f32.gmra.mxu2 %v490_v51  ;;  %v306_v51 = vld [vmem:[%s3609_s4 + $0x58] sm:$0xff] }
  0x89   :  { %399 = vmatmul.f32.gmra.mxu0 %v199_v62  ;;  %464 = vmatmul.f32.gmra.mxu1 %v200_v63  ;;  %v2354_v62 = vmov 0  }
  0x8a   :  { %2054 = vset.pattern.permute.xlu1 %v2354_v62  ;;  %2053 = vset.pattern.permute.xlu0 %v2354_v62 }
  0x8b   :  { %839 = vperm.xlu1 %2054, %v296_v60   ;;  %2055 = vset.pattern.permute.xlu2 %v2354_v62  ;;  %v324_v60 = vld [vmem:[%s3610_s5 + $0x68] sm:$0xff] }
  0x90   :  { %543 = vmatmul.f32.gmra.mxu2 %v491_v58  ;;  %v504_v58 = vld [vmem:[#allocation2 + $0x78] sm:$0xff] }
  0xc6   :  { %v2573_v0 = vpop.f32.mrf.mxu0  ;;  %v2575_v1 = vpop.f32.mrf.mxu1 }
  0xca   :  { %v2577_v2 = vpop.f32.mrf.mxu3 }
  0xcb   :  { %v2579_v3 = vpop.f32.mrf.mxu2 }
  0xcc   :  { %v469_v56 = vadd.f32 %v2579_v3, %v2577_v2  ;;  %v492_v3 = vld [vmem:[#allocation2 + $0x18] sm:$0xff] }
  0xcd   :  { %546 = vmatmul.f32.gmra.mxu2 %v492_v3  ;;  %v322_v3 = vld [vmem:[%s3610_s5 + $0x58] sm:$0xff] }
  0xce   :  { %v2581_v4 = vpop.f32.mrf.mxu0  ;;  %v2583_v5 = vpop.f32.mrf.mxu1 }
  0xcf   :  { %v445_v13 = vadd.f32 %v2583_v5, %v2581_v4  ;;  %v1999_v4 = vld [vmem:[#allocation7 + $0x8] sm:$0xff]  }
  0xd0   :  { %v2642_v5 = vunpack.c.l.bf16 %v1999_v4  ;;  %v2651_v21 = vunpack.c.h.bf16 %v1999_v4 }
  0xd2   :  { %v2585_v6 = vpop.f32.mrf.mxu3 }
  0xd3   :  { %v2587_v7 = vpop.f32.mrf.mxu2 }
  0xd4   :  { %v472_v53 = vadd.f32 %v2587_v7, %v2585_v6  ;;  %v312_v7 = vld [vmem:[%s3610_s5 + $0x8] sm:$0xff] }
  0xd5   :  { %968 = vperm.xlu1 %2054, %v312_v7   ;;  %549 = vmatmul.f32.gmra.mxu2 %v493_v16  ;;  %v2005_v7 = vld [vmem:[#allocation7 + $0x38] sm:$0xff]  }
  0xd6   :  { %v2589_v8 = vpop.f32.mrf.mxu0  ;;  %v2591_v9 = vpop.f32.mrf.mxu1 }
  0xda   :  { %v2593_v10 = vpop.f32.mrf.mxu3 }
  0xdb   :  { %v474_v11 = vpop.f32.mrf.mxu2 }
  0xdc   :  { %v475_v52 = vadd.f32 %v474_v11, %v2593_v10  ;;  %v295_v10 = vld [vmem:[%s3609_s4] sm:$0xff]  ;;  %v448_v11 = vadd.f32 %v2591_v9, %v2589_v8  ;;  %v2633_v9 = vunpack.c.h.bf16 %v1961_v12 }
  0xdd   :  { %834 = vperm.xlu0 %2053, %v295_v10   ;;  %v311_v8 = vld [vmem:[%s3610_s5] sm:$0xff]  ;;  %552 = vmatmul.f32.gmra.mxu2 %v494_v17  ;;  %v2746_v10 = vunpack.c.l.bf16 %v2005_v7  ;;  %v325_v17 = vld [vmem:[%s3610_s5 + $0x70] sm:$0xff] }
  0xde   :  { %v2595_v14 = vpop.f32.mrf.mxu0  ;;  %v2597_v15 = vpop.f32.mrf.mxu1 }
  0xdf   :  { %v451_v6 = vadd.f32 %v2597_v15, %v2595_v14  ;;  %v2625_v14 = vunpack.c.l.bf16 %v1961_v12  ;;  %v442_v15 = vadd.f32 %v2575_v1, %v2573_v0  ;;  %v314_v0 = vld [vmem:[%s3610_s5 + $0x18] sm:$0xff] }
  0xe0   :  { %v298_v1 = vld [vmem:[%s3609_s4 + $0x18] sm:$0xff]  ;;  %978 = vperm.xlu1 %2054, %v314_v0  }
  0xe1   :  { %v326_v12 = vld [vmem:[%s3610_s5 + $0x78] sm:$0xff] }
  0xe2   :  { %v412_v18 = vpop.f32.mrf.mxu3 }
  0xe3   :  { %v477_v19 = vpop.f32.mrf.mxu2 }
  0xe4   :  { %v478_v50 = vadd.f32 %v477_v19, %v412_v18  ;;  %v495_v18 = vld [vmem:[#allocation2 + $0x30] sm:$0xff] }
  0xe5   :  { %963 = vperm.xlu0 %2053, %v311_v8   ;;  %555 = vmatmul.f32.gmra.mxu2 %v495_v18  ;;  %v297_v19 = vld [vmem:[%s3609_s4 + $0x10] sm:$0xff]  ;;  %v308_v8 = vld [vmem:[%s3609_s4 + $0x68] sm:$0xff] }
  0xe6   :  { %v2599_v22 = vpop.f32.mrf.mxu0  ;;  %v2601_v23 = vpop.f32.mrf.mxu1  ;;  %844 = vperm.xlu2 %2055, %v297_v19  }
  0xe7   :  { %v454_v2 = vadd.f32 %v2601_v23, %v2599_v22  ;;  %v496_v22 = vld [vmem:[#allocation2 + $0x38] sm:$0xff]  ;;  %v313_v23 = vld [vmem:[%s3610_s5 + $0x10] sm:$0xff] }
  0xe8   :  { %859 = vperm.xlu1 %2054, %v300_v24  }
  0xea   :  { %v415_v26 = vpop.f32.mrf.mxu3 }
  0xeb   :  { %v480_v27 = vpop.f32.mrf.mxu2 }
  0xec   :  { %v481_v49 = vadd.f32 %v480_v27, %v415_v26  ;;  %v2660_v26 = vunpack.c.l.bf16 %v2000_v25  ;;  %v497_v27 = vld [vmem:[#allocation2 + $0x40] sm:$0xff] }
  0xed   :  { %849 = vperm.xlu0 %2053, %v298_v1   ;;  %558 = vmatmul.f32.gmra.mxu2 %v496_v22 }
  0xee   :  { %v391_v30 = vpop.f32.mrf.mxu0  ;;  %v456_v31 = vpop.f32.mrf.mxu1  ;;  %973 = vperm.xlu2 %2055, %v313_v23  }
  0xef   :  { %v457_v63 = vadd.f32 %v456_v31, %v391_v30  ;;  %v2669_v30 = vunpack.c.h.bf16 %v2000_v25  ;;  %v498_v31 = vld [vmem:[#allocation2 + $0x48] sm:$0xff] }
  0xf0   :  { %993 = vperm.xlu1 %2054, %v317_v28  }
  0xf2   :  { %v418_v34 = vpop.f32.mrf.mxu3 }
  0xf3   :  { %v483_v35 = vpop.f32.mrf.mxu2 }
  0xf4   :  { %v484_v46 = vadd.f32 %v483_v35, %v418_v34  ;;  %v2001_v34 = vld [vmem:[#allocation7 + $0x18] sm:$0xff]  }
  0xf5   :  { %983 = vperm.xlu0 %2053, %v315_v20   ;;  %561 = vmatmul.f32.gmra.mxu2 %v497_v27  ;;  %v2678_v35 = vunpack.c.l.bf16 %v2001_v34 }
  0xf6   :  { %v394_v38 = vpop.f32.mrf.mxu0  ;;  %v459_v39 = vpop.f32.mrf.mxu1  ;;  %854 = vperm.xlu2 %2055, %v299_v32  }
  0xf7   :  { %v460_v61 = vadd.f32 %v459_v39, %v394_v38  ;;  %v303_v38 = vld [vmem:[%s3609_s4 + $0x40] sm:$0xff]  ;;  %v2687_v39 = vunpack.c.h.bf16 %v2001_v34 }
  0xf8   :  { %874 = vperm.xlu1 %2054, %v303_v38  }
  0xfa   :  { %v421_v42 = vpop.f32.mrf.mxu3 }
  0xfb   :  { %v486_v43 = vpop.f32.mrf.mxu2 }
  0xfc   :  { %v487_v44 = vadd.f32 %v486_v43, %v421_v42  ;;  %v304_v42 = vld [vmem:[%s3609_s4 + $0x48] sm:$0xff]  ;;  %v2002_v43 = vld [vmem:[#allocation7 + $0x20] sm:$0xff]  }
  0xfd   :  { %864 = vperm.xlu0 %2053, %v301_v29   ;;  %564 = vmatmul.f32.gmra.mxu2 %v498_v31  ;;  %v2786_v25 = vpop.permute.xlu1 %839 }
  0xfe   :  { %586 = vmatpush.msrb.mxu3 %v487_v44  ;;  %v397_v47 = vpop.f32.mrf.mxu0  ;;  %v462_v48 = vpop.f32.mrf.mxu1  ;;  %988 = vperm.xlu2 %2055, %v316_v37   ;;  %v2696_v44 = vunpack.c.l.bf16 %v2002_v43  ;;  %3706 = vst [vmem:[#allocation25_spill] sm:$0xff] %v2786_v25 }
  0xff   :  { %v463_v59 = vadd.f32 %v462_v48, %v397_v47  ;;  %v321_v47 = vld [vmem:[%s3610_s5 + $0x50] sm:$0xff]  ;;  %v2705_v48 = vunpack.c.h.bf16 %v2002_v43 }
 0x100   :  { %587 = vmatpush.msrb.mxu3 %v484_v46  ;;  %1008 = vperm.xlu1 %2054, %v320_v41   ;;  %v302_v46 = vld [vmem:[%s3609_s4 + $0x38] sm:$0xff] }
 0x102   :  { %588 = vmatpush.msrb.mxu3 %v481_v49  ;;  %v502_v49 = vld [vmem:[#allocation2 + $0x68] sm:$0xff] }
 0x104   :  { %589 = vmatpush.msrb.mxu3 %v478_v50  ;;  %v319_v50 = vld [vmem:[%s3610_s5 + $0x40] sm:$0xff] }
 0x105   :  { %998 = vperm.xlu0 %2053, %v318_v33   ;;  %567 = vmatmul.f32.gmra.mxu2 %v499_v36 }
 0x106   :  { %590 = vmatpush.msrb.mxu3 %v475_v52  ;;  %v400_v54 = vpop.f32.mrf.mxu0  ;;  %v465_v55 = vpop.f32.mrf.mxu1  ;;  %869 = vperm.xlu2 %2055, %v302_v46   ;;  %v2003_v52 = vld [vmem:[#allocation7 + $0x28] sm:$0xff]  }
 0x107   :  { %v466_v57 = vadd.f32 %v465_v55, %v400_v54  ;;  %v503_v54 = vld [vmem:[#allocation2 + $0x70] sm:$0xff]  ;;  %v323_v55 = vld [vmem:[%s3610_s5 + $0x60] sm:$0xff] }
 0x108   :  { %591 = vmatpush.msrb.mxu3 %v472_v53  ;;  %889 = vperm.xlu1 %2054, %v306_v51   ;;  %v2714_v53 = vunpack.c.l.bf16 %v2003_v52 }
 0x10a   :  { %592 = vmatpush.msrb.mxu3 %v469_v56  ;;  %v307_v56 = vld [vmem:[%s3609_s4 + $0x60] sm:$0xff] }
 0x10c   :  { %593 = vmatpush.msrb.mxu3 %v466_v57  ;;  %v2723_v57 = vunpack.c.h.bf16 %v2003_v52 }
 0x10d   :  { %570 = vmatmul.f32.gmra.mxu2 %v500_v40  ;;  %879 = vperm.xlu0 %2053, %v304_v42  }
 0x10e   :  { %594 = vmatpush.msrb.mxu3 %v463_v59  ;;  %1003 = vperm.xlu2 %2055, %v319_v50   ;;  %v305_v59 = vld [vmem:[%s3609_s4 + $0x50] sm:$0xff] }
 0x110   :  { %595 = vmatpush.msrb.mxu3 %v460_v61  ;;  %1023 = vperm.xlu1 %2054, %v323_v55   ;;  %v2004_v61 = vld [vmem:[#allocation7 + $0x30] sm:$0xff]  }
 0x111   :  { %v2732_v62 = vunpack.c.l.bf16 %v2004_v61 }
 0x112   :  { %596 = vmatpush.msrb.mxu3 %v457_v63  ;;  %v2735_v63 = vpop.f32.mrf.mxu2 }
 0x114   :  { %597 = vmatpush.msrb.mxu3 %v454_v2  ;;  %v2737_v2 = vunpack.c.h.bf16 %v2004_v61  ;;  %v813_v61 = vlaneseq }
 0x115   :  { %573 = vmatmul.f32.gmra.mxu2 %v501_v45  ;;  %1013 = vperm.xlu0 %2053, %v321_v47  }
 0x116   :  { %598 = vmatpush.msrb.mxu3 %v451_v6  ;;  %884 = vperm.xlu2 %2055, %v305_v59   ;;  %v309_v6 = vld [vmem:[%s3609_s4 + $0x70] sm:$0xff] }
 0x118   :  { %599 = vmatpush.msrb.mxu3 %v448_v11  ;;  %904 = vperm.xlu1 %2054, %v309_v6  }
 0x11a   :  { %600 = vmatpush.msrb.mxu3 %v445_v13  ;;  %v2748_v11 = vpop.f32.mrf.mxu2  ;;  %v310_v13 = vld [vmem:[%s3609_s4 + $0x78] sm:$0xff] }
 0x11c   :  { %601 = vmatpush.msrb.mxu3 %v442_v15  ;;  %v2757_v15 = vunpack.c.h.bf16 %v2005_v7 }
 0x11d   :  { %602 = vmatmul.f32.vlgmr.msrb.gmra.mxu3 %v2625_v14  ;;  %576 = vmatmul.f32.gmra.mxu2 %v502_v49 }
 0x11e   :  { %894 = vperm.xlu0 %2053, %v307_v56   ;;  %1018 = vperm.xlu2 %2055, %v322_v3  }
 0x120   :  { %1038 = vperm.xlu1 %2054, %v326_v12   ;;  %v2838_v12 = vshrl.u32 %v813_v61, 7 }
 0x122   :  { %v2759_v16 = vpop.f32.mrf.mxu2  ;;  %vm944_vm0 = vcmp.lt.s32.totalorder %v2838_v12, 1  ;;  %vm815_vm1 = vcmp.lt.s32.totalorder %v2838_v12, 7 }
 0x125   :  { %605 = vmatmul.f32.gmra.mxu3 %v2633_v9  ;;  %579 = vmatmul.f32.gmra.mxu2 %v503_v54 }
 0x126   :  { %1028 = vperm.xlu0 %2053, %v324_v60   ;;  %899 = vperm.xlu2 %2055, %v308_v8  }
 0x12d   :  { %608 = vmatmul.f32.gmra.mxu3 %v2642_v5  ;;  %582 = vmatmul.f32.gmra.mxu2 %v504_v58 }
 0x12e   :  { %909 = vperm.xlu0 %2053, %v310_v13   ;;  %1033 = vperm.xlu2 %2055, %v325_v17  }
 0x135   :  { %611 = vmatmul.f32.gmra.mxu3 %v2651_v21 }
 0x13d   :  { %614 = vmatmul.f32.gmra.mxu3 %v2660_v26 }
 0x140   :  { %v2790_v28 = vpop.permute.xlu2 %844 }
 0x141   :  { %3707 = vst [vmem:[#allocation26_spill] sm:$0xff] %v2790_v28 }
 0x145   :  { %617 = vmatmul.f32.gmra.mxu3 %v2669_v30 }
 0x147   :  { %v2798_v33 = vpop.permute.xlu1 %968 }
 0x148   :  { %3709 = vst [vmem:[#allocation28_spill] sm:$0xff] %v2798_v33  ;;  %v2800_v34 = vpop.permute.xlu2 %973 }
 0x149   :  { %3710 = vst [vmem:[#allocation29_spill] sm:$0xff] %v2800_v34 }
 0x14d   :  { %620 = vmatmul.f32.gmra.mxu3 %v2678_v35 }
 0x14f   :  { %v2782_v23 = vpop.permute.xlu0 %834 }
 0x150   :  { %v2768_v0 = vpop.f32.mrf.mxu2  ;;  %3705 = vst [vmem:[#allocation24_spill] sm:$0xff] %v2782_v23  ;;  %v2808_v41 = vpop.permute.xlu2 %854 }
 0x151   :  { %3713 = vst [vmem:[#allocation32_spill] sm:$0xff] %v2808_v41 }
 0x152   :  { %v2806_v40 = vpop.permute.xlu1 %978 }
 0x153   :  { %3712 = vst [vmem:[#allocation31_spill] sm:$0xff] %v2806_v40 }
 0x155   :  { %623 = vmatmul.f32.gmra.mxu3 %v2687_v39 }
 0x157   :  { %v2792_v29 = vpop.permute.xlu0 %963 }
 0x158   :  { %v2774_v18 = vpop.f32.mrf.mxu2  ;;  %3708 = vst [vmem:[#allocation27_spill] sm:$0xff] %v2792_v29  ;;  %v2816_v49 = vpop.permute.xlu2 %988 }
 0x159   :  { %3716 = vst [vmem:[#allocation35_spill] sm:$0xff] %v2816_v49 }
 0x15a   :  { %v2814_v45 = vpop.permute.xlu1 %859 }
 0x15b   :  { %3715 = vst [vmem:[#allocation34_spill] sm:$0xff] %v2814_v45 }
 0x15d   :  { %626 = vmatmul.f32.gmra.mxu3 %v2696_v44 }
 0x15f   :  { %v2802_v36 = vpop.permute.xlu0 %849 }
 0x160   :  { %v2778_v20 = vpop.f32.mrf.mxu2  ;;  %3711 = vst [vmem:[#allocation30_spill] sm:$0xff] %v2802_v36  ;;  %v2822_v55 = vpop.permute.xlu2 %869 }
 0x161   :  { %3719 = vst [vmem:[#allocation38_spill] sm:$0xff] %v2822_v55 }
 0x162   :  { %v2820_v51 = vpop.permute.xlu1 %993 }
 0x163   :  { %3718 = vst [vmem:[#allocation37_spill] sm:$0xff] %v2820_v51 }
 0x165   :  { %629 = vmatmul.f32.gmra.mxu3 %v2705_v48 }
 0x167   :  { %v2812_v43 = vpop.permute.xlu0 %983 }
 0x168   :  { %v2784_v24 = vpop.f32.mrf.mxu2  ;;  %3714 = vst [vmem:[#allocation33_spill] sm:$0xff] %v2812_v43 }
 0x16a   :  { %v2830_v60 = vpop.permute.xlu1 %874 }
 0x16b   :  { %3723 = vst [vmem:[#allocation42_spill] sm:$0xff] %v2830_v60 }
 0x16d   :  { %632 = vmatmul.f32.gmra.mxu3 %v2714_v53 }
 0x16f   :  { %v2818_v50 = vpop.permute.xlu0 %864 }
 0x170   :  { %v2794_v31 = vpop.f32.mrf.mxu2  ;;  %3717 = vst [vmem:[#allocation36_spill] sm:$0xff] %v2818_v50 }
 0x172   :  { %v2853_v61 = vpop.permute.xlu1 %1008 }
 0x173   :  { %3727 = vst [vmem:[#allocation46_spill] sm:$0xff] %v2853_v61 }
 0x175   :  { %635 = vmatmul.f32.gmra.mxu3 %v2723_v57 }
 0x177   :  { %v2826_v58 = vpop.permute.xlu0 %998 }
 0x178   :  { %v562_v38 = vpop.f32.mrf.mxu2  ;;  %3721 = vst [vmem:[#allocation40_spill] sm:$0xff] %v2826_v58 }
 0x17d   :  { %638 = vmatmul.f32.gmra.mxu3 %v2732_v62 }
 0x180   :  { %v565_v46 = vpop.f32.mrf.mxu2 }
 0x185   :  { %641 = vmatmul.f32.gmra.mxu3 %v2737_v2 }
 0x188   :  { %v568_v52 = vpop.f32.mrf.mxu2 }
 0x18d   :  { %644 = vmatmul.f32.gmra.mxu3 %v2746_v10 }
 0x190   :  { %v571_v6 = vpop.f32.mrf.mxu2 }
 0x195   :  { %647 = vmatmul.f32.gmra.mxu3 %v2757_v15 }
 0x198   :  { %v574_v55 = vpop.f32.mrf.mxu2 }
 0x1a0   :  { %v2770_v1 = vpop.f32.mrf.mxu3 }
 0x1a8   :  { %v2772_v4 = vpop.f32.mrf.mxu3 }
 0x1b0   :  { %v2776_v19 = vpop.f32.mrf.mxu3 }
 0x1b8   :  { %v2780_v22 = vpop.f32.mrf.mxu3 }
 0x1c0   :  { %v2788_v27 = vpop.f32.mrf.mxu3 }
 0x1c8   :  { %v2796_v32 = vpop.f32.mrf.mxu3 }
 0x1d0   :  { %v2804_v37 = vpop.f32.mrf.mxu3 }
 0x1d8   :  { %v2810_v42 = vpop.f32.mrf.mxu3 }
 0x1e0   :  { %v627_v47 = vpop.f32.mrf.mxu3 }
 0x1e1   :  { %v2828_v59 = vadd.f32 %v627_v47, %v562_v38  ;;  %v2846_v47 = vpop.permute.xlu0 %879 }
 0x1e2   :  { %3726 = vst [vmem:[#allocation45_spill] sm:$0xff] %v2846_v47 }
 0x1e3   :  { %3722 = vst [vmem:[#allocation41_spill] sm:$0xff] %v2828_v59  ;;  %v2836_v7 = vmax.f32 %v2828_v59, 0.0 }
 0x1e5   :  { %v3629_v38 = vrot.slane %v2836_v7, 7 }
 0x1e8   :  { %v630_v54 = vpop.f32.mrf.mxu3 }
 0x1e9   :  { %v2824_v56 = vadd.f32 %v630_v54, %v565_v46  ;;  %v2843_v46 = vpop.permute.xlu2 %1003 }
 0x1ea   :  { %3725 = vst [vmem:[#allocation44_spill] sm:$0xff] %v2843_v46 }
 0x1eb   :  { %3720 = vst [vmem:[#allocation39_spill] sm:$0xff] %v2824_v56  ;;  %v2833_v3 = vmax.f32 %v2824_v56, 0.0 }
 0x1ed   :  { %v937_v8 = vrot.slane %v2833_v3, 7  ;;  %v3635_v59 = vrot.slane %v2833_v3, 1 }
 0x1f0   :  { %v633_v13 = vpop.f32.mrf.mxu3 }
 0x1f1   :  { %v2841_v17 = vadd.f32 %v633_v13, %v568_v52  ;;  %v951_v52 = vsel %vm944_vm0, %v3629_v38, %v937_v8  ;;  %v2874_v49 = vpop.permute.xlu2 %884 }
 0x1f2   :  { %v1050_v60 = vmul.f32 %v2853_v61, %v951_v52  ;;  %3730 = vst [vmem:[#allocation49_spill] sm:$0xff] %v2874_v49  ;;  %v577_v61 = vpop.f32.mrf.mxu2 }
 0x1f3   :  { %3724 = vst [vmem:[#allocation43_spill] sm:$0xff] %v2841_v17  ;;  %v2849_v54 = vmax.f32 %v2841_v17, 0.0 }
 0x1f5   :  { %v807_v13 = vrot.slane %v2849_v54, 1  ;;  %v938_v56 = vrot.slane %v2849_v54, 7 }
 0x1f7   :  { %v950_v17 = vsel %vm944_vm0, %v937_v8, %v938_v56  ;;  %v821_v46 = vsel %vm815_vm1, %v3635_v59, %v807_v13  ;;  %v2879_v8 = vpop.permute.xlu0 %1013 }
 0x1f8   :  { %v636_v58 = vpop.f32.mrf.mxu3  ;;  %v921_v38 = vmul.f32 %v2846_v47, %v821_v46  ;;  %3731 = vst [vmem:[#allocation50_spill] sm:$0xff] %v2879_v8 }
 0x1f9   :  { %v2870_v51 = vadd.f32 %v636_v58, %v571_v6  ;;  %v2896_v41 = vpop.permute.xlu2 %1018 }
 0x1fa   :  { %v2872_v50 = vadd.f32 %v1050_v60, %v921_v38  ;;  %v1051_v60 = vmul.f32 %v2879_v8, %v950_v17  ;;  %v2889_v38 = vpop.permute.xlu1 %889  ;;  %3735 = vst [vmem:[#allocation54_spill] sm:$0xff] %v2896_v41 }
 0x1fb   :  { %3728 = vst [vmem:[#allocation47_spill] sm:$0xff] %v2870_v51  ;;  %v2877_v45 = vmax.f32 %v2870_v51, 0.0 }
 0x1fc   :  { %3729 = vst [vmem:[#allocation48_spill] sm:$0xff] %v2872_v50 }
 0x1fd   :  { %v808_v43 = vrot.slane %v2877_v45, 1  ;;  %v939_v59 = vrot.slane %v2877_v45, 7  ;;  %3732 = vst [vmem:[#allocation51_spill] sm:$0xff] %v2889_v38 }
 0x1ff   :  { %v949_v52 = vsel %vm944_vm0, %v938_v56, %v939_v59  ;;  %v820_v58 = vsel %vm815_vm1, %v807_v13, %v808_v43 }
 0x200   :  { %v639_v6 = vpop.f32.mrf.mxu3  ;;  %v922_v46 = vmul.f32 %v2874_v49, %v820_v58  ;;  %v1052_v58 = vmul.f32 %v2896_v41, %v949_v52 }
 0x201   :  { %v2891_v51 = vadd.f32 %v639_v6, %v574_v55 }
 0x202   :  { %v2893_v47 = vadd.f32 %v1051_v60, %v922_v46  ;;  %v2908_v46 = vpop.permute.xlu1 %1023 }
 0x203   :  { %3733 = vst [vmem:[#allocation52_spill] sm:$0xff] %v2891_v51  ;;  %v663_v50 = vmax.f32 %v2891_v51, 0.0  ;;  %v2910_v51 = vpop.permute.xlu0 %894 }
 0x204   :  { %3734 = vst [vmem:[#allocation53_spill] sm:$0xff] %v2893_v47  ;;  %v580_v47 = vpop.f32.mrf.mxu2 }
 0x205   :  { %v809_v56 = vrot.slane %v663_v50, 1  ;;  %v940_v40 = vrot.slane %v663_v50, 7  ;;  %3738 = vst [vmem:[#allocation57_spill] sm:$0xff] %v2908_v46 }
 0x206   :  { %3739 = vst [vmem:[#allocation58_spill] sm:$0xff] %v2910_v51 }
 0x207   :  { %v948_v13 = vsel %vm944_vm0, %v939_v59, %v940_v40  ;;  %v819_v17 = vsel %vm815_vm1, %v808_v43, %v809_v56 }
 0x208   :  { %v642_v8 = vpop.f32.mrf.mxu3  ;;  %v923_v55 = vmul.f32 %v2889_v38, %v819_v17 }
 0x209   :  { %v2904_v6 = vadd.f32 %v642_v8, %v577_v61  ;;  %v1053_v61 = vmul.f32 %v2908_v46, %v948_v13 }
 0x20a   :  { %v2906_v60 = vadd.f32 %v1052_v58, %v923_v55  ;;  %v2921_v55 = vpop.permute.xlu2 %899  ;;  %v2926_v38 = vpop.permute.xlu1 %904 }
 0x20b   :  { %3736 = vst [vmem:[#allocation55_spill] sm:$0xff] %v2904_v6  ;;  %v664_v49 = vmax.f32 %v2904_v6, 0.0 }
 0x20c   :  { %3737 = vst [vmem:[#allocation56_spill] sm:$0xff] %v2906_v60  ;;  %v583_v60 = vpop.f32.mrf.mxu2 }
 0x20d   :  { %v810_v59 = vrot.slane %v664_v49, 1  ;;  %v941_v36 = vrot.slane %v664_v49, 7  ;;  %3741 = vst [vmem:[#allocation60_spill] sm:$0xff] %v2921_v55 }
 0x20f   :  { %v947_v43 = vsel %vm944_vm0, %v940_v40, %v941_v36  ;;  %v818_v52 = vsel %vm815_vm1, %v809_v56, %v810_v59  ;;  %v2930_v40 = vadd.f32 %v2770_v1, %v2735_v63  ;;  %v2932_v56 = vpop.permute.xlu0 %1028 }
 0x210   :  { %v645_v8 = vpop.f32.mrf.mxu3  ;;  %v924_v17 = vmul.f32 %v2910_v51, %v818_v52  ;;  %3744 = vst [vmem:[#allocation63_spill] sm:$0xff] %v2932_v56 }
 0x211   :  { %v2919_v58 = vadd.f32 %v645_v8, %v580_v47  ;;  %3743 = vst [vmem:[#allocation62_spill] sm:$0xff] %v2930_v40 }
 0x212   :  { %v2923_v41 = vadd.f32 %v1053_v61, %v924_v17  ;;  %v1054_v61 = vmul.f32 %v2932_v56, %v947_v43 }
 0x213   :  { %3740 = vst [vmem:[#allocation59_spill] sm:$0xff] %v2919_v58  ;;  %v665_v6 = vmax.f32 %v2919_v58, 0.0  ;;  %v2941_v58 = vmax.f32 %v2930_v40, 0.0 }
 0x214   :  { %3742 = vst [vmem:[#allocation61_spill] sm:$0xff] %v2923_v41  ;;  %v2950_v41 = vpop.permute.xlu2 %1033 }
 0x215   :  { %v811_v13 = vrot.slane %v665_v6, 1  ;;  %v942_v46 = vrot.slane %v665_v6, 7 }
 0x217   :  { %v946_v47 = vsel %vm944_vm0, %v941_v36, %v942_v46  ;;  %v817_v52 = vsel %vm815_vm1, %v810_v59, %v811_v13  ;;  %v3661_v36 = vrot.slane %v2941_v58, 1  ;;  %v2954_v59 = vpop.permute.xlu1 %1038 }
 0x218   :  { %v648_v8 = vpop.f32.mrf.mxu3  ;;  %v925_v17 = vmul.f32 %v2921_v55, %v817_v52  ;;  %v2957_v52 = vpop.permute.xlu0 %909 }
 0x219   :  { %v2943_v63 = vadd.f32 %v648_v8, %v583_v60 }
 0x21a   :  { %v2945_v1 = vadd.f32 %v1054_v61, %v925_v17 }
 0x21b   :  { %3745 = vst [vmem:[#allocation64_spill] sm:$0xff] %v2943_v63  ;;  %v2948_v51 = vmax.f32 %v2943_v63, 0.0  ;;  %v1055_v63 = vmul.f32 %v2950_v41, %v946_v47  ;;  %v1994_v47 = vld [vmem:[#allocation5 + $0x18] sm:$0xff]  }
 0x21c   :  { %3746 = vst [vmem:[#allocation65_spill] sm:$0xff] %v2945_v1 }
 0x21d   :  { %667 = vmatpush.msrb.mxu0 %v2948_v51  ;;  %v3662_v43 = vrot.slane %v2948_v51, 7  ;;  %v812_v60 = vrot.slane %v2948_v51, 1 }
 0x21f   :  { %v945_v61 = vsel %vm944_vm0, %v942_v46, %v3662_v43  ;;  %v831_v8 = vsel %vm815_vm1, %v812_v60, %v3661_v36  ;;  %668 = vmatpush.msrb.mxu0 %v665_v6  ;;  %v816_v17 = vsel %vm815_vm1, %v811_v13, %v812_v60  ;;  %v2981_v6 = vadd.f32 %v2810_v42, %v2794_v31 }
 0x220   :  { %v1056_v56 = vmul.f32 %v2954_v59, %v945_v61  ;;  %v927_v55 = vmul.f32 %v2957_v52, %v831_v8  ;;  %v926_v40 = vmul.f32 %v2926_v38, %v816_v17  ;;  %v2986_v13 = vadd.f32 %v2804_v37, %v2784_v24  ;;  %v1995_v61 = vld [vmem:[#allocation5 + $0x20] sm:$0xff]  }
 0x221   :  { %669 = vmatpush.msrb.mxu0 %v664_v49  ;;  %v2991_v49 = vadd.f32 %v2796_v32, %v2778_v20  ;;  %v2999_v31 = vadd.f32 %v2788_v27, %v2774_v18  ;;  %v3007_v24 = vadd.f32 %v2780_v22, %v2768_v0  ;;  %v3015_v32 = vadd.f32 %v2776_v19, %v2759_v16  ;;  %v1929_v16 = vld [vmem:[#allocation5] sm:$0xff]  }
 0x222   :  { %v2974_v1 = vadd.f32 %v1056_v56, %v927_v55  ;;  %v2976_v46 = vadd.f32 %v1055_v63, %v926_v40  ;;  %v3002_v42 = vmax.f32 %v2986_v13, 0.0  ;;  %v3023_v27 = vadd.f32 %v2772_v4, %v2748_v11  ;;  %v1992_v4 = vld [vmem:[#allocation5 + $0x8] sm:$0xff]   ;;  %v1993_v55 = vld [vmem:[#allocation5 + $0x10] sm:$0xff]  }
 0x223   :  { %670 = vmatpush.msrb.mxu0 %v663_v50  ;;  %v2994_v50 = vmax.f32 %v2981_v6, 0.0  ;;  %v3010_v20 = vmax.f32 %v2991_v49, 0.0  ;;  %v3018_v18 = vmax.f32 %v2999_v31, 0.0  ;;  %v3026_v0 = vmax.f32 %v3007_v24, 0.0 }
 0x224   :  { %3747 = vst [vmem:[#allocation66_spill] sm:$0xff] %v3023_v27  ;;  %v3030_v22 = vmax.f32 %v3015_v32, 0.0  ;;  %v3034_v19 = vmax.f32 %v3023_v27, 0.0  ;;  %v3037_v37 = vunpack.c.l.bf16 %v1929_v16  ;;  %v3042_v11 = vunpack.c.h.bf16 %v1929_v16  ;;  %v1996_v16 = vld [vmem:[#allocation5 + $0x28] sm:$0xff]  }
 0x225   :  { %671 = vmatpush.msrb.mxu0 %v2877_v45  ;;  %v3045_v45 = vunpack.c.l.bf16 %v1992_v4  ;;  %v3051_v40 = vunpack.c.l.bf16 %v1993_v55  ;;  %v3054_v56 = vunpack.c.h.bf16 %v1993_v55  ;;  %v3057_v63 = vunpack.c.l.bf16 %v1994_v47 }
 0x226   :  { %3748 = vst [vmem:[#allocation67_spill] sm:$0xff] %v3037_v37  ;;  %v3060_v60 = vunpack.c.h.bf16 %v1994_v47  ;;  %v3063_v8 = vunpack.c.l.bf16 %v1995_v61  ;;  %v3066_v17 = vunpack.c.h.bf16 %v1995_v61  ;;  %v3072_v55 = vunpack.c.h.bf16 %v1996_v16  ;;  %v1997_v47 = vld [vmem:[#allocation5 + $0x30] sm:$0xff]   ;;  %v1998_v61 = vld [vmem:[#allocation5 + $0x38] sm:$0xff]  }
 0x227   :  { %672 = vmatpush.msrb.mxu0 %v2849_v54  ;;  %3749 = vst [vmem:[#allocation68_spill] sm:$0xff] %v3042_v11  ;;  %v3048_v54 = vunpack.c.h.bf16 %v1992_v4  ;;  %v3069_v4 = vunpack.c.l.bf16 %v1996_v16  ;;  %v3075_v36 = vunpack.c.l.bf16 %v1997_v47  ;;  %v3078_v43 = vunpack.c.h.bf16 %v1997_v47 }
 0x228   :  { %3750 = vst [vmem:[#allocation69_spill] sm:$0xff] %v3045_v45 }
 0x229   :  { %673 = vmatpush.msrb.mxu0 %v2833_v3  ;;  %3751 = vst [vmem:[#allocation70_spill] sm:$0xff] %v3048_v54 }
 0x22a   :  { %3752 = vst [vmem:[#allocation71_spill] sm:$0xff] %v3051_v40 }
 0x22b   :  { %674 = vmatpush.msrb.mxu0 %v2836_v7  ;;  %3753 = vst [vmem:[#allocation72_spill] sm:$0xff] %v3054_v56 }
 0x22c   :  { %3754 = vst [vmem:[#allocation73_spill] sm:$0xff] %v3057_v63 }
 0x22d   :  { %675 = vmatpush.msrb.mxu0 %v2994_v50  ;;  %3755 = vst [vmem:[#allocation74_spill] sm:$0xff] %v3060_v60 }
 0x22e   :  { %3756 = vst [vmem:[#allocation75_spill] sm:$0xff] %v3063_v8 }
 0x22f   :  { %676 = vmatpush.msrb.mxu0 %v3002_v42  ;;  %3757 = vst [vmem:[#allocation76_spill] sm:$0xff] %v3066_v17 }
 0x230   :  { %3758 = vst [vmem:[#allocation77_spill] sm:$0xff] %v3069_v4 }
 0x231   :  { %677 = vmatpush.msrb.mxu0 %v3010_v20  ;;  %3759 = vst [vmem:[#allocation78_spill] sm:$0xff] %v3072_v55 }
 0x232   :  { %3760 = vst [vmem:[#allocation79_spill] sm:$0xff] %v3075_v36 }
 0x233   :  { %678 = vmatpush.msrb.mxu0 %v3018_v18  ;;  %3761 = vst [vmem:[#allocation80_spill] sm:$0xff] %v3078_v43 }
 0x235   :  { %679 = vmatpush.msrb.mxu0 %v3026_v0 }
 0x237   :  { %680 = vmatpush.msrb.mxu0 %v3030_v22 }
 0x239   :  { %681 = vmatpush.msrb.mxu0 %v3034_v19 }
 0x23b   :  { %682 = vmatpush.msrb.mxu0 %v2941_v58 }
 0x23c   :  { %683 = vmatmul.f32.vlgmr.msrb.gmra.mxu0 %v3037_v37 }
 0x244   :  { %686 = vmatmul.f32.gmra.mxu0 %v3042_v11 }
 0x24c   :  { %689 = vmatmul.f32.gmra.mxu0 %v3045_v45 }
 0x254   :  { %692 = vmatmul.f32.gmra.mxu0 %v3048_v54 }
 0x25c   :  { %695 = vmatmul.f32.gmra.mxu0 %v3051_v40 }
 0x264   :  { %698 = vmatmul.f32.gmra.mxu0 %v3054_v56 }
 0x26c   :  { %701 = vmatmul.f32.gmra.mxu0 %v3057_v63 }
 0x274   :  { %704 = vmatmul.f32.gmra.mxu0 %v3060_v60 }
 0x27c   :  { %707 = vmatmul.f32.gmra.mxu0 %v3063_v8  ;;  %v3084_v8 = vunpack.c.h.bf16 %v1998_v61 }
 0x284   :  { %710 = vmatmul.f32.gmra.mxu0 %v3066_v17  ;;  %v3081_v17 = vunpack.c.l.bf16 %v1998_v61  ;;  %v280_v61 = vld [vmem:[#allocation13 + $0x8] sm:$0xff] }
 0x286   :  { %3762 = vst [vmem:[#allocation81_spill] sm:$0xff] %v3081_v17 }
 0x28c   :  { %713 = vmatmul.f32.gmra.mxu0 %v3069_v4 }
 0x294   :  { %716 = vmatmul.f32.gmra.mxu0 %v3072_v55 }
 0x29c   :  { %719 = vmatmul.f32.gmra.mxu0 %v3075_v36 }
 0x2a4   :  { %722 = vmatmul.f32.gmra.mxu0 %v3078_v43 }
 0x2ac   :  { %725 = vmatmul.f32.gmra.mxu0 %v3081_v17 }
 0x2b4   :  { %728 = vmatmul.f32.gmra.mxu0 %v3084_v8 }
 0x2b9   :  { %v684_v16 = vpop.f32.mrf.mxu0 }
 0x2c1   :  { %v687_v55 = vpop.f32.mrf.mxu0 }
 0x2c9   :  { %v690_v4 = vpop.f32.mrf.mxu0 }
 0x2d1   :  { %v693_v60 = vpop.f32.mrf.mxu0 }
 0x2d9   :  { %v696_v63 = vpop.f32.mrf.mxu0 }
 0x2e1   :  { %v699_v56 = vpop.f32.mrf.mxu0 }
 0x2e9   :  { %v702_v36 = vpop.f32.mrf.mxu0 }
 0x2f1   :  { %v705_v47 = vpop.f32.mrf.mxu0 }
 0x2f9   :  { %v708_v40 = vpop.f32.mrf.mxu0 }
 0x301   :  { %v711_v54 = vpop.f32.mrf.mxu0 }
 0x309   :  { %v714_v43 = vpop.f32.mrf.mxu0 }
 0x311   :  { %v717_v45 = vpop.f32.mrf.mxu0 }
 0x319   :  { %v720_v11 = vpop.f32.mrf.mxu0 }
 0x321   :  { %v723_v37 = vpop.f32.mrf.mxu0 }
 0x329   :  { %v726_v27 = vpop.f32.mrf.mxu0 }
 0x331   :  { %v729_v17 = vpop.f32.mrf.mxu0 }
 0x332   :  { %732 = vmatpush.msrb.mxu1 %v729_v17  ;;  %v283_v17 = vld [vmem:[#allocation13 + $0x20] sm:$0xff] }
 0x334   :  { %733 = vmatpush.msrb.mxu1 %v726_v27  ;;  %v292_v27 = vld [vmem:[#allocation13 + $0x68] sm:$0xff] }
 0x336   :  { %734 = vmatpush.msrb.mxu1 %v723_v37  ;;  %v291_v37 = vld [vmem:[#allocation13 + $0x60] sm:$0xff] }
 0x338   :  { %735 = vmatpush.msrb.mxu1 %v720_v11  ;;  %v290_v11 = vld [vmem:[#allocation13 + $0x58] sm:$0xff] }
 0x33a   :  { %736 = vmatpush.msrb.mxu1 %v717_v45  ;;  %v289_v45 = vld [vmem:[#allocation13 + $0x50] sm:$0xff] }
 0x33c   :  { %737 = vmatpush.msrb.mxu1 %v714_v43  ;;  %v293_v43 = vld [vmem:[#allocation13 + $0x70] sm:$0xff] }
 0x33e   :  { %738 = vmatpush.msrb.mxu1 %v711_v54  ;;  %v288_v54 = vld [vmem:[#allocation13 + $0x48] sm:$0xff] }
 0x340   :  { %739 = vmatpush.msrb.mxu1 %v708_v40  ;;  %v287_v40 = vld [vmem:[#allocation13 + $0x40] sm:$0xff] }
 0x342   :  { %740 = vmatpush.msrb.mxu1 %v705_v47  ;;  %v928_v47 = vrot.slane %v2941_v58, 7 }
 0x344   :  { %741 = vmatpush.msrb.mxu1 %v702_v36  ;;  %v294_v36 = vld [vmem:[#allocation13 + $0x78] sm:$0xff] }
 0x345   :  { %1089 = vmatpush.msra.mxu2 %v294_v36 }
 0x346   :  { %742 = vmatpush.msrb.mxu1 %v699_v56  ;;  %v286_v56 = vld [vmem:[#allocation13 + $0x38] sm:$0xff] }
 0x347   :  { %1090 = vmatpush.msra.mxu2 %v293_v43 }
 0x348   :  { %743 = vmatpush.msrb.mxu1 %v696_v63  ;;  %v285_v63 = vld [vmem:[#allocation13 + $0x30] sm:$0xff] }
 0x349   :  { %1091 = vmatpush.msra.mxu2 %v292_v27 }
 0x34a   :  { %744 = vmatpush.msrb.mxu1 %v693_v60  ;;  %v284_v60 = vld [vmem:[#allocation13 + $0x28] sm:$0xff] }
 0x34b   :  { %1092 = vmatpush.msra.mxu2 %v291_v37 }
 0x34c   :  { %745 = vmatpush.msrb.mxu1 %v690_v4  ;;  %v282_v4 = vld [vmem:[#allocation13 + $0x18] sm:$0xff] }
 0x34d   :  { %1093 = vmatpush.msra.mxu2 %v290_v11 }
 0x34e   :  { %746 = vmatpush.msrb.mxu1 %v687_v55  ;;  %v281_v55 = vld [vmem:[#allocation13 + $0x10] sm:$0xff] }
 0x34f   :  { %1094 = vmatpush.msra.mxu2 %v289_v45 }
 0x350   :  { %747 = vmatpush.msrb.mxu1 %v684_v16  ;;  %v279_v16 = vld [vmem:[#allocation13] sm:$0xff] }
 0x351   :  { %748 = vmatmul.f32.vlgmr.msrb.gmra.mxu1 %v2625_v14  ;;  %1095 = vmatpush.msra.mxu2 %v288_v54 }
 0x352   :  { %1444 = vmatpush.msra.mxu1 %v294_v36  ;;  %v798_v36 = vrot.slane %v3034_v19, 1 }
 0x353   :  { %1096 = vmatpush.msra.mxu2 %v287_v40 }
 0x354   :  { %1445 = vmatpush.msra.mxu1 %v293_v43  ;;  %v3763_v43 = vrot.slane %v2948_v51, 7 }
 0x355   :  { %1097 = vmatpush.msra.mxu2 %v286_v56 }
 0x356   :  { %1446 = vmatpush.msra.mxu1 %v292_v27  ;;  %v960_v27 = vsel %vm944_vm0, %v3763_v43, %v928_v47 }
 0x357   :  { %1098 = vmatpush.msra.mxu2 %v285_v63 }
 0x358   :  { %1447 = vmatpush.msra.mxu1 %v291_v37  ;;  %v3764_v37 = vrot.slane %v2941_v58, 1 }
 0x359   :  { %751 = vmatmul.f32.gmra.mxu1 %v2633_v9  ;;  %1099 = vmatpush.msra.mxu2 %v284_v60 }
 0x35a   :  { %1448 = vmatpush.msra.mxu1 %v290_v11  ;;  %v830_v11 = vsel %vm815_vm1, %v3764_v37, %v798_v36 }
 0x35b   :  { %1100 = vmatpush.msra.mxu2 %v283_v17 }
 0x35c   :  { %1449 = vmatpush.msra.mxu1 %v289_v45  ;;  %v1041_v45 = vmul.f32 %v2792_v29, %v960_v27  ;;  %v3803_v29 = vld [vmem:[#allocation60_spill] sm:$0xff] }
 0x35d   :  { %1101 = vmatpush.msra.mxu2 %v282_v4 }
 0x35e   :  { %1450 = vmatpush.msra.mxu1 %v288_v54  ;;  %v799_v54 = vrot.slane %v3030_v22, 1 }
 0x35f   :  { %1102 = vmatpush.msra.mxu2 %v281_v55 }
 0x360   :  { %1451 = vmatpush.msra.mxu1 %v287_v40  ;;  %v912_v40 = vmul.f32 %v2782_v23, %v830_v11  ;;  %v801_v11 = vrot.slane %v3018_v18, 1  ;;  %v3800_v23 = vld [vmem:[#allocation57_spill] sm:$0xff] }
 0x361   :  { %754 = vmatmul.f32.gmra.mxu1 %v2642_v5  ;;  %1103 = vmatpush.msra.mxu2 %v280_v61 }
 0x362   :  { %1452 = vmatpush.msra.mxu1 %v286_v56  ;;  %v929_v56 = vrot.slane %v3034_v19, 7 }
 0x363   :  { %1104 = vmatpush.msra.mxu2 %v279_v16 }
 0x364   :  { %1453 = vmatpush.msra.mxu1 %v285_v63  ;;  %v1057_v63 = vadd.f32 %v1041_v45, %v912_v40  ;;  %v959_v58 = vsel %vm944_vm0, %v928_v47, %v929_v56  ;;  %v931_v40 = vrot.slane %v3026_v0, 7 }
 0x366   :  { %1454 = vmatpush.msra.mxu1 %v284_v60  ;;  %v829_v60 = vsel %vm815_vm1, %v798_v36, %v799_v54 }
 0x368   :  { %1455 = vmatpush.msra.mxu1 %v283_v17 }
 0x369   :  { %757 = vmatmul.f32.gmra.mxu1 %v2651_v21 }
 0x36a   :  { %1456 = vmatpush.msra.mxu1 %v282_v4  ;;  %v913_v4 = vmul.f32 %v2786_v25, %v829_v60  ;;  %v3796_v25 = vld [vmem:[#allocation54_spill] sm:$0xff] }
 0x36c   :  { %1457 = vmatpush.msra.mxu1 %v281_v55  ;;  %v800_v55 = vrot.slane %v3026_v0, 1 }
 0x36e   :  { %1458 = vmatpush.msra.mxu1 %v280_v61  ;;  %v1042_v61 = vmul.f32 %v2798_v33, %v959_v58  ;;  %v828_v27 = vsel %vm815_vm1, %v799_v54, %v800_v55  ;;  %v802_v58 = vrot.slane %v3010_v20, 1  ;;  %v3792_v33 = vld [vmem:[#allocation50_spill] sm:$0xff] }
 0x36f   :  { %v914_v47 = vmul.f32 %v2790_v28, %v828_v27 }
 0x370   :  { %1459 = vmatpush.msra.mxu1 %v279_v16  ;;  %v930_v16 = vrot.slane %v3030_v22, 7  ;;  %v1058_v43 = vadd.f32 %v1042_v61, %v913_v4  ;;  %v3766_v4 = vld [vmem:[#allocation31_spill] sm:$0xff]  ;;  %v826_v27 = vsel %vm815_vm1, %v801_v11, %v802_v58 }
 0x371   :  { %760 = vmatmul.f32.gmra.mxu1 %v2660_v26 }
 0x372   :  { %v958_v36 = vsel %vm944_vm0, %v929_v56, %v930_v16  ;;  %v957_v54 = vsel %vm944_vm0, %v930_v16, %v931_v40  ;;  %v3765_v56 = vld [vmem:[#allocation30_spill] sm:$0xff]  ;;  %v3767_v16 = vld [vmem:[#allocation32_spill] sm:$0xff] }
 0x373   :  { %v1043_v45 = vmul.f32 %v2800_v34, %v958_v36  ;;  %v1044_v61 = vmul.f32 %v3766_v4, %v957_v54  ;;  %v916_v36 = vmul.f32 %v3767_v16, %v826_v27  ;;  %v934_v27 = vrot.slane %v3002_v42, 7 }
 0x379   :  { %763 = vmatmul.f32.gmra.mxu1 %v2669_v30 }
 0x381   :  { %766 = vmatmul.f32.gmra.mxu1 %v2678_v35 }
 0x389   :  { %769 = vmatmul.f32.gmra.mxu1 %v2687_v39 }
 0x391   :  { %772 = vmatmul.f32.gmra.mxu1 %v2696_v44 }
 0x399   :  { %775 = vmatmul.f32.gmra.mxu1 %v2705_v48 }
 0x3a1   :  { %778 = vmatmul.f32.gmra.mxu1 %v2714_v53 }
 0x3a9   :  { %781 = vmatmul.f32.gmra.mxu1 %v2723_v57 }
 0x3b1   :  { %784 = vmatmul.f32.gmra.mxu1 %v2732_v62 }
 0x3b9   :  { %787 = vmatmul.f32.gmra.mxu1 %v2737_v2 }
 0x3c1   :  { %790 = vmatmul.f32.gmra.mxu1 %v2746_v10 }
 0x3c9   :  { %793 = vmatmul.f32.gmra.mxu1 %v2757_v15 }
 0x3ce   :  { %v749_v51 = vpop.f32.mrf.mxu1 }
 0x3cf   :  { %v1073_v17 = vsub.f32 %v749_v51, %v1057_v63  ;;  %v1059_v63 = vadd.f32 %v1043_v45, %v914_v47  ;;  %v827_v51 = vsel %vm815_vm1, %v800_v55, %v801_v11  ;;  %v803_v47 = vrot.slane %v3002_v42, 1  ;;  %v3768_v45 = vld [vmem:[#allocation33_spill] sm:$0xff] }
 0x3d1   :  { %1105 = vmatmul.f32.vlgmr.msra.gmra.mxu2 %v1073_v17  ;;  %v915_v17 = vmul.f32 %v3765_v56, %v827_v51 }
 0x3d6   :  { %v752_v19 = vpop.f32.mrf.mxu1 }
 0x3d7   :  { %v1074_v37 = vsub.f32 %v752_v19, %v1058_v43  ;;  %v932_v43 = vrot.slane %v3018_v18, 7  ;;  %v1060_v19 = vadd.f32 %v1044_v61, %v915_v17  ;;  %v804_v61 = vrot.slane %v2994_v50, 1 }
 0x3d9   :  { %1108 = vmatmul.f32.gmra.mxu2 %v1074_v37  ;;  %v956_v55 = vsel %vm944_vm0, %v931_v40, %v932_v43  ;;  %v3769_v40 = vld [vmem:[#allocation34_spill] sm:$0xff] }
 0x3de   :  { %v755_v22 = vpop.f32.mrf.mxu1 }
 0x3df   :  { %v1075_v60 = vsub.f32 %v755_v22, %v1059_v63  ;;  %v1045_v63 = vmul.f32 %v3768_v45, %v956_v55  ;;  %v933_v22 = vrot.slane %v3010_v20, 7  ;;  %v824_v55 = vsel %vm815_vm1, %v803_v47, %v804_v61 }
 0x3e1   :  { %1111 = vmatmul.f32.gmra.mxu2 %v1075_v60  ;;  %v1061_v51 = vadd.f32 %v1045_v63, %v916_v36  ;;  %v825_v60 = vsel %vm815_vm1, %v802_v58, %v803_v47  ;;  %v955_v11 = vsel %vm944_vm0, %v932_v43, %v933_v22  ;;  %v954_v58 = vsel %vm944_vm0, %v933_v22, %v934_v27  ;;  %v3771_v43 = vld [vmem:[#allocation36_spill] sm:$0xff]  ;;  %v3773_v22 = vld [vmem:[#allocation38_spill] sm:$0xff] }
 0x3e2   :  { %v917_v17 = vmul.f32 %v3769_v40, %v825_v60  ;;  %v918_v63 = vmul.f32 %v3771_v43, %v824_v55 }
 0x3e6   :  { %v758_v0 = vpop.f32.mrf.mxu1 }
 0x3e7   :  { %v1076_v37 = vsub.f32 %v758_v0, %v1060_v19  ;;  %v3770_v19 = vld [vmem:[#allocation35_spill] sm:$0xff] }
 0x3e8   :  { %v1046_v0 = vmul.f32 %v3770_v19, %v955_v11  ;;  %v3789_v19 = vld [vmem:[#allocation47_spill] sm:$0xff] }
 0x3e9   :  { %1114 = vmatmul.f32.gmra.mxu2 %v1076_v37 }
 0x3ea   :  { %v1062_v37 = vadd.f32 %v1046_v0, %v917_v17 }
 0x3ee   :  { %v761_v18 = vpop.f32.mrf.mxu1 }
 0x3ef   :  { %v1077_v54 = vsub.f32 %v761_v18, %v1061_v51  ;;  %v805_v51 = vrot.slane %v2836_v7, 1  ;;  %v3772_v18 = vld [vmem:[#allocation37_spill] sm:$0xff] }
 0x3f0   :  { %v1047_v60 = vmul.f32 %v3772_v18, %v954_v58  ;;  %v3775_v58 = vrot.slane %v2833_v3, 1  ;;  %v3779_v3 = vld [vmem:[#allocation48_spill] sm:$0xff] }
 0x3f1   :  { %1117 = vmatmul.f32.gmra.mxu2 %v1077_v54  ;;  %v935_v54 = vrot.slane %v2994_v50, 7  ;;  %v823_v17 = vsel %vm815_vm1, %v804_v61, %v805_v51 }
 0x3f2   :  { %v1063_v11 = vadd.f32 %v1047_v60, %v918_v63  ;;  %v822_v50 = vsel %vm815_vm1, %v805_v51, %v3775_v58  ;;  %v3776_v60 = vrot.slane %v2836_v7, 7  ;;  %v3781_v58 = vld [vmem:[#allocation56_spill] sm:$0xff] }
 0x3f3   :  { %v953_v47 = vsel %vm944_vm0, %v934_v27, %v935_v54  ;;  %v3777_v27 = vld [vmem:[#allocation42_spill] sm:$0xff] }
 0x3f4   :  { %v952_v61 = vsel %vm944_vm0, %v935_v54, %v3776_v60 }
 0x3f6   :  { %v764_v20 = vpop.f32.mrf.mxu1 }
 0x3f7   :  { %v1078_v36 = vsub.f32 %v764_v20, %v1062_v37  ;;  %v919_v37 = vmul.f32 %v3773_v22, %v823_v17  ;;  %v3774_v20 = vld [vmem:[#allocation40_spill] sm:$0xff] }
 0x3f8   :  { %v1048_v55 = vmul.f32 %v3774_v20, %v953_v47 }
 0x3f9   :  { %1120 = vmatmul.f32.gmra.mxu2 %v1078_v36 }
 0x3fa   :  { %v1064_v36 = vadd.f32 %v1048_v55, %v919_v37 }
 0x3fe   :  { %v767_v42 = vpop.f32.mrf.mxu1 }
 0x3ff   :  { %v1079_v0 = vsub.f32 %v767_v42, %v1063_v11  ;;  %v920_v11 = vmul.f32 %v3777_v27, %v822_v50  ;;  %v3778_v42 = vld [vmem:[#allocation44_spill] sm:$0xff]  ;;  %v3782_v50 = vld [vmem:[#allocation61_spill] sm:$0xff] }
 0x400   :  { %v1049_v17 = vmul.f32 %v3778_v42, %v952_v61 }
 0x401   :  { %1123 = vmatmul.f32.gmra.mxu2 %v1079_v0 }
 0x402   :  { %v1065_v0 = vadd.f32 %v1049_v17, %v920_v11  ;;  %v3783_v11 = vld [vmem:[#allocation65_spill] sm:$0xff] }
 0x406   :  { %v770_v43 = vpop.f32.mrf.mxu1 }
 0x407   :  { %v1080_v63 = vsub.f32 %v770_v43, %v1064_v36  ;;  %v3780_v43 = vld [vmem:[#allocation53_spill] sm:$0xff] }
 0x409   :  { %1126 = vmatmul.f32.gmra.mxu2 %v1080_v63 }
 0x40e   :  { %v773_v47 = vpop.f32.mrf.mxu1 }
 0x40f   :  { %v1081_v37 = vsub.f32 %v773_v47, %v1065_v0 }
 0x411   :  { %1129 = vmatmul.f32.gmra.mxu2 %v1081_v37 }
 0x416   :  { %v776_v55 = vpop.f32.mrf.mxu1 }
 0x417   :  { %v1082_v20 = vsub.f32 %v776_v55, %v3779_v3 }
 0x419   :  { %1132 = vmatmul.f32.gmra.mxu2 %v1082_v20 }
 0x41e   :  { %v779_v51 = vpop.f32.mrf.mxu1 }
 0x41f   :  { %v1083_v36 = vsub.f32 %v779_v51, %v3780_v43 }
 0x421   :  { %1135 = vmatmul.f32.gmra.mxu2 %v1083_v36 }
 0x426   :  { %v782_v7 = vpop.f32.mrf.mxu1 }
 0x427   :  { %v1084_v54 = vsub.f32 %v782_v7, %v3781_v58 }
 0x429   :  { %1138 = vmatmul.f32.gmra.mxu2 %v1084_v54 }
 0x42e   :  { %v785_v63 = vpop.f32.mrf.mxu1 }
 0x42f   :  { %v1085_v60 = vsub.f32 %v785_v63, %v3782_v50  ;;  %v3784_v50 = vld [vmem:[#allocation39_spill] sm:$0xff] }
 0x431   :  { %1141 = vmatmul.f32.gmra.mxu2 %v1085_v60  ;;  %v3785_v60 = vld [vmem:[#allocation41_spill] sm:$0xff] }
 0x436   :  { %v788_v61 = vpop.f32.mrf.mxu1 }
 0x437   :  { %v1086_v17 = vsub.f32 %v788_v61, %v3783_v11 }
 0x439   :  { %1144 = vmatmul.f32.gmra.mxu2 %v1086_v17 }
 0x43e   :  { %v791_v0 = vpop.f32.mrf.mxu1 }
 0x43f   :  { %v1087_v47 = vsub.f32 %v791_v0, %v2976_v46 }
 0x441   :  { %1147 = vmatmul.f32.gmra.mxu2 %v1087_v47 }
 0x446   :  { %v794_v20 = vpop.f32.mrf.mxu1 }
 0x447   :  { %v1088_v37 = vsub.f32 %v794_v20, %v2974_v1  ;;  %v3786_v20 = vld [vmem:[#allocation43_spill] sm:$0xff] }
 0x449   :  { %1150 = vmatmul.f32.gmra.mxu2 %v1088_v37 }
 0x454   :  { %v1106_v55 = vpop.f32.mrf.mxu2 }
 0x45c   :  { %v3188_v3 = vpop.f32.mrf.mxu2 }
 0x464   :  { %v3190_v51 = vpop.f32.mrf.mxu2 }
 0x46c   :  { %v3192_v43 = vpop.f32.mrf.mxu2 }
 0x474   :  { %v3194_v36 = vpop.f32.mrf.mxu2 }
 0x47c   :  { %v3196_v7 = vpop.f32.mrf.mxu2 }
 0x484   :  { %v3198_v58 = vpop.f32.mrf.mxu2 }
 0x48c   :  { %v3200_v54 = vpop.f32.mrf.mxu2 }
 0x494   :  { %v1130_v46 = vpop.f32.mrf.mxu2 }
 0x495   :  { %v1162_v61 = vadd.f32 %v1130_v46, %v3785_v60 }
 0x497   :  { %v3206_v17 = vmax.f32 %v1162_v61, 0.0 }
 0x499   :  { %v3695_v42 = vrot.slane %v3206_v17, 7 }
 0x49c   :  { %v1133_v63 = vpop.f32.mrf.mxu2 }
 0x49d   :  { %v1163_v1 = vadd.f32 %v1133_v63, %v3784_v50  ;;  %v3788_v50 = vld [vmem:[#allocation46_spill] sm:$0xff] }
 0x49f   :  { %v3204_v11 = vmax.f32 %v1163_v1, 0.0 }
 0x4a1   :  { %v1373_v47 = vrot.slane %v3204_v11, 7  ;;  %v3696_v22 = vrot.slane %v3204_v11, 1 }
 0x4a3   :  { %v1386_v46 = vsel %vm944_vm0, %v3695_v42, %v1373_v47 }
 0x4a4   :  { %v1136_v0 = vpop.f32.mrf.mxu2 }
 0x4a5   :  { %v1164_v37 = vadd.f32 %v1136_v0, %v3786_v20  ;;  %v1405_v20 = vmul.f32 %v1386_v46, %v3788_v50 }
 0x4a7   :  { %v3211_v27 = vmax.f32 %v1164_v37, 0.0  ;;  %v3787_v37 = vld [vmem:[#allocation45_spill] sm:$0xff] }
 0x4a9   :  { %v1326_v18 = vrot.slane %v3211_v27, 1  ;;  %v1374_v63 = vrot.slane %v3211_v27, 7 }
 0x4ab   :  { %v1337_v1 = vsel %vm815_vm1, %v3696_v22, %v1326_v18  ;;  %v1385_v61 = vsel %vm944_vm0, %v1373_v47, %v1374_v63  ;;  %v3791_v47 = vld [vmem:[#allocation49_spill] sm:$0xff] }
 0x4ac   :  { %v1139_v0 = vpop.f32.mrf.mxu2  ;;  %v1357_v60 = vmul.f32 %v1337_v1, %v3787_v37  ;;  %v1406_v1 = vmul.f32 %v1385_v61, %v3792_v33  ;;  %v3793_v37 = vld [vmem:[#allocation52_spill] sm:$0xff] }
 0x4ad   :  { %v1165_v40 = vadd.f32 %v1139_v0, %v3789_v19 }
 0x4ae   :  { %v3229_v45 = vadd.f32 %v1405_v20, %v1357_v60 }
 0x4af   :  { %v1181_v16 = vmax.f32 %v1165_v40, 0.0 }
 0x4b0   :  { %3790 = vst [vmem:[#allocation48_spill] sm:$0xff] %v3229_v45 }
 0x4b1   :  { %v1327_v4 = vrot.slane %v1181_v16, 1  ;;  %v1375_v42 = vrot.slane %v1181_v16, 7 }
 0x4b3   :  { %v1336_v56 = vsel %vm815_vm1, %v1326_v18, %v1327_v4  ;;  %v1384_v22 = vsel %vm944_vm0, %v1374_v63, %v1375_v42  ;;  %v3795_v63 = vld [vmem:[#allocation51_spill] sm:$0xff] }
 0x4b4   :  { %v1142_v34 = vpop.f32.mrf.mxu2  ;;  %v1358_v28 = vmul.f32 %v1336_v56, %v3791_v47  ;;  %v1407_v56 = vmul.f32 %v1384_v22, %v3796_v25  ;;  %v3797_v47 = vld [vmem:[#allocation55_spill] sm:$0xff] }
 0x4b5   :  { %v1166_v50 = vadd.f32 %v1142_v34, %v3793_v37 }
 0x4b6   :  { %v3238_v46 = vadd.f32 %v1406_v1, %v1358_v28 }
 0x4b7   :  { %v1182_v60 = vmax.f32 %v1166_v50, 0.0 }
 0x4b8   :  { %3794 = vst [vmem:[#allocation53_spill] sm:$0xff] %v3238_v46 }
 0x4b9   :  { %v1328_v20 = vrot.slane %v1182_v60, 1  ;;  %v1376_v40 = vrot.slane %v1182_v60, 7 }
 0x4bb   :  { %v1335_v0 = vsel %vm815_vm1, %v1327_v4, %v1328_v20  ;;  %v1383_v18 = vsel %vm944_vm0, %v1375_v42, %v1376_v40  ;;  %v3799_v42 = vld [vmem:[#allocation58_spill] sm:$0xff] }
 0x4bc   :  { %v1145_v19 = vpop.f32.mrf.mxu2  ;;  %v1359_v45 = vmul.f32 %v1335_v0, %v3795_v63  ;;  %v1408_v0 = vmul.f32 %v1383_v18, %v3800_v23  ;;  %v3801_v63 = vld [vmem:[#allocation59_spill] sm:$0xff] }
 0x4bd   :  { %v1167_v33 = vadd.f32 %v1145_v19, %v3797_v47  ;;  %v3802_v19 = vld [vmem:[#allocation62_spill] sm:$0xff] }
 0x4be   :  { %v3247_v61 = vadd.f32 %v1407_v56, %v1359_v45  ;;  %v1154_v56 = vadd.f32 %v1106_v55, %v3802_v19 }
 0x4bf   :  { %v1183_v28 = vmax.f32 %v1167_v33, 0.0 }
 0x4c0   :  { %3798 = vst [vmem:[#allocation56_spill] sm:$0xff] %v3247_v61  ;;  %v3265_v18 = vmax.f32 %v1154_v56, 0.0 }
 0x4c1   :  { %v1329_v34 = vrot.slane %v1183_v28, 1  ;;  %v1377_v1 = vrot.slane %v1183_v28, 7 }
 0x4c3   :  { %v1334_v50 = vsel %vm815_vm1, %v1328_v20, %v1329_v34  ;;  %v1382_v4 = vsel %vm944_vm0, %v1376_v40, %v1377_v1 }
 0x4c4   :  { %v1148_v37 = vpop.f32.mrf.mxu2  ;;  %v1360_v46 = vmul.f32 %v1334_v50, %v3799_v42  ;;  %v3804_v42 = vld [vmem:[#allocation63_spill] sm:$0xff] }
 0x4c5   :  { %v1168_v25 = vadd.f32 %v1148_v37, %v3801_v63  ;;  %v1409_v23 = vmul.f32 %v1382_v4, %v3804_v42  ;;  %v3805_v37 = vld [vmem:[#allocation64_spill] sm:$0xff]  ;;  %v1161_v42 = vadd.f32 %v3200_v54, %v2981_v6 }
 0x4c6   :  { %v3256_v22 = vadd.f32 %v1408_v0, %v1360_v46 }
 0x4c7   :  { %v1184_v45 = vmax.f32 %v1168_v25, 0.0  ;;  %v3703_v25 = vrot.slane %v3265_v18, 1  ;;  %v3846_v12 = vld [vmem:[#allocation56_spill] sm:$0xff] }
 0x4c9   :  { %v1330_v33 = vrot.slane %v1184_v45, 1  ;;  %v1378_v47 = vrot.slane %v1184_v45, 7 }
 0x4cb   :  { %v1333_v20 = vsel %vm815_vm1, %v1329_v34, %v1330_v33  ;;  %v1381_v40 = vsel %vm944_vm0, %v1377_v1, %v1378_v47 }
 0x4cc   :  { %v1151_v61 = vpop.f32.mrf.mxu2  ;;  %v1361_v50 = vmul.f32 %v1333_v20, %v3803_v29  ;;  %v1410_v56 = vmul.f32 %v1381_v40, %v2950_v41  ;;  %v1159_v41 = vadd.f32 %v3196_v7, %v2991_v49  ;;  %v1156_v7 = vadd.f32 %v3190_v51, %v3015_v32  ;;  %v3807_v51 = vld [vmem:[#allocation67_spill] sm:$0xff]  ;;  %v3808_v40 = vld [vmem:[#allocation68_spill] sm:$0xff] }
 0x4cd   :  { %v1169_v46 = vadd.f32 %v1151_v61, %v3805_v37 }
 0x4ce   :  { %v3268_v0 = vadd.f32 %v1409_v23, %v1361_v50  ;;  %v3810_v23 = vld [vmem:[#allocation70_spill] sm:$0xff] }
 0x4cf   :  { %v3270_v55 = vmax.f32 %v1169_v46, 0.0  ;;  %v3811_v46 = vld [vmem:[#allocation71_spill] sm:$0xff] }
 0x4d1   :  { %v1331_v34 = vrot.slane %v3270_v55, 1  ;;  %v3704_v19 = vrot.slane %v3270_v55, 7  ;;  %1186 = vmatpush.msra.mxu3 %v3270_v55 }
 0x4d3   :  { %1187 = vmatpush.msra.mxu3 %v1184_v45  ;;  %v1332_v29 = vsel %vm815_vm1, %v1330_v33, %v1331_v34  ;;  %v1347_v61 = vsel %vm815_vm1, %v1331_v34, %v3703_v25  ;;  %v1380_v1 = vsel %vm944_vm0, %v1378_v47, %v3704_v19  ;;  %v3812_v34 = vld [vmem:[#allocation72_spill] sm:$0xff] }
 0x4d4   :  { %v1362_v4 = vmul.f32 %v1332_v29, %v2926_v38  ;;  %v1363_v20 = vmul.f32 %v1347_v61, %v2957_v52  ;;  %v1411_v45 = vmul.f32 %v1380_v1, %v2954_v59  ;;  %v1160_v38 = vadd.f32 %v3198_v58, %v2986_v13  ;;  %v3813_v29 = vld [vmem:[#allocation73_spill] sm:$0xff]  ;;  %v3814_v61 = vld [vmem:[#allocation74_spill] sm:$0xff]  ;;  %v3815_v1 = vld [vmem:[#allocation75_spill] sm:$0xff] }
 0x4d5   :  { %1188 = vmatpush.msra.mxu3 %v1183_v28  ;;  %v3302_v59 = vmax.f32 %v1161_v42, 0.0  ;;  %v1158_v52 = vadd.f32 %v3194_v36, %v2999_v31  ;;  %v3312_v58 = vmax.f32 %v1159_v41, 0.0  ;;  %v3325_v28 = vmax.f32 %v1156_v7, 0.0  ;;  %v3820_v42 = vld [vmem:[#allocation80_spill] sm:$0xff] }
 0x4d6   :  { %v3290_v33 = vadd.f32 %v1410_v56, %v1362_v4  ;;  %v3292_v50 = vadd.f32 %v1411_v45, %v1363_v20  ;;  %v3816_v4 = vld [vmem:[#allocation76_spill] sm:$0xff]  ;;  %v3817_v56 = vld [vmem:[#allocation77_spill] sm:$0xff]  ;;  %v3818_v20 = vld [vmem:[#allocation78_spill] sm:$0xff] }
 0x4d7   :  { %1189 = vmatpush.msra.mxu3 %v1182_v60  ;;  %v3317_v54 = vmax.f32 %v1158_v52, 0.0  ;;  %v3806_v60 = vld [vmem:[#allocation66_spill] sm:$0xff]  ;;  %v3819_v45 = vld [vmem:[#allocation79_spill] sm:$0xff] }
 0x4d8   :  { %v1155_v36 = vadd.f32 %v3188_v3, %v3806_v60  ;;  %v3809_v3 = vld [vmem:[#allocation69_spill] sm:$0xff] }
 0x4d9   :  { %1190 = vmatpush.msra.mxu3 %v1181_v16  ;;  %v3307_v16 = vmax.f32 %v1160_v38, 0.0  ;;  %v3821_v38 = vld [vmem:[#allocation81_spill] sm:$0xff] }
 0x4db   :  { %1191 = vmatpush.msra.mxu3 %v3211_v27  ;;  %v1157_v27 = vadd.f32 %v3192_v43, %v3007_v24  ;;  %v3328_v43 = vmax.f32 %v1155_v36, 0.0 }
 0x4dd   :  { %1192 = vmatpush.msra.mxu3 %v3204_v11  ;;  %v3322_v47 = vmax.f32 %v1157_v27, 0.0 }
 0x4df   :  { %1193 = vmatpush.msra.mxu3 %v3206_v17 }
 0x4e1   :  { %1194 = vmatpush.msra.mxu3 %v3302_v59 }
 0x4e3   :  { %1195 = vmatpush.msra.mxu3 %v3307_v16 }
 0x4e5   :  { %1196 = vmatpush.msra.mxu3 %v3312_v58 }
 0x4e7   :  { %1197 = vmatpush.msra.mxu3 %v3317_v54 }
 0x4e9   :  { %1198 = vmatpush.msra.mxu3 %v3322_v47 }
 0x4eb   :  { %1199 = vmatpush.msra.mxu3 %v3325_v28 }
 0x4ed   :  { %1200 = vmatpush.msra.mxu3 %v3328_v43 }
 0x4ef   :  { %1201 = vmatpush.msra.mxu3 %v3265_v18 }
 0x4f0   :  { %1202 = vmatmul.f32.vlgmr.msra.gmra.mxu3 %v3807_v51 }
 0x4f8   :  { %1205 = vmatmul.f32.gmra.mxu3 %v3808_v40 }
 0x500   :  { %1208 = vmatmul.f32.gmra.mxu3 %v3809_v3 }
 0x508   :  { %1211 = vmatmul.f32.gmra.mxu3 %v3810_v23 }
 0x510   :  { %1214 = vmatmul.f32.gmra.mxu3 %v3811_v46 }
 0x518   :  { %1217 = vmatmul.f32.gmra.mxu3 %v3812_v34 }
 0x520   :  { %1220 = vmatmul.f32.gmra.mxu3 %v3813_v29 }
 0x528   :  { %1223 = vmatmul.f32.gmra.mxu3 %v3814_v61 }
 0x530   :  { %1226 = vmatmul.f32.gmra.mxu3 %v3815_v1 }
 0x538   :  { %1229 = vmatmul.f32.gmra.mxu3 %v3816_v4 }
 0x540   :  { %1232 = vmatmul.f32.gmra.mxu3 %v3817_v56 }
 0x548   :  { %1235 = vmatmul.f32.gmra.mxu3 %v3818_v20 }
 0x550   :  { %1238 = vmatmul.f32.gmra.mxu3 %v3819_v45 }
 0x558   :  { %1241 = vmatmul.f32.gmra.mxu3 %v3820_v42 }
 0x560   :  { %1244 = vmatmul.f32.gmra.mxu3 %v3821_v38 }
 0x568   :  { %1247 = vmatmul.f32.gmra.mxu3 %v3084_v8 }
 0x573   :  { %v1203_v41 = vpop.f32.mrf.mxu3 }
 0x57b   :  { %v1206_v52 = vpop.f32.mrf.mxu3 }
 0x583   :  { %v1209_v27 = vpop.f32.mrf.mxu3 }
 0x58b   :  { %v1212_v7 = vpop.f32.mrf.mxu3 }
 0x593   :  { %v1215_v36 = vpop.f32.mrf.mxu3 }
 0x59b   :  { %v1218_v25 = vpop.f32.mrf.mxu3 }
 0x5a3   :  { %v1221_v19 = vpop.f32.mrf.mxu3 }
 0x5ab   :  { %v1224_v4 = vpop.f32.mrf.mxu3 }
 0x5b3   :  { %v1227_v1 = vpop.f32.mrf.mxu3 }
 0x5bb   :  { %v1230_v56 = vpop.f32.mrf.mxu3 }
 0x5c3   :  { %v1233_v61 = vpop.f32.mrf.mxu3 }
 0x5cb   :  { %v1236_v20 = vpop.f32.mrf.mxu3 }
 0x5d3   :  { %v1239_v29 = vpop.f32.mrf.mxu3 }
 0x5db   :  { %v1242_v45 = vpop.f32.mrf.mxu3 }
 0x5e3   :  { %v1245_v34 = vpop.f32.mrf.mxu3 }
 0x5eb   :  { %v1248_v42 = vpop.f32.mrf.mxu3 }
 0x5ec   :  { %1251 = vmatpush.msra.mxu0 %v1248_v42 }
 0x5ee   :  { %1252 = vmatpush.msra.mxu0 %v1245_v34  ;;  %v3827_v34 = vld [vmem:[#allocation28_spill] sm:$0xff] }
 0x5f0   :  { %1253 = vmatpush.msra.mxu0 %v1242_v45  ;;  %v3828_v45 = vld [vmem:[#allocation26_spill] sm:$0xff] }
 0x5f2   :  { %1254 = vmatpush.msra.mxu0 %v1239_v29 }
 0x5f4   :  { %1255 = vmatpush.msra.mxu0 %v1236_v20 }
 0x5f6   :  { %1256 = vmatpush.msra.mxu0 %v1233_v61  ;;  %v1366_v61 = vrot.slane %v3325_v28, 7 }
 0x5f8   :  { %1257 = vmatpush.msra.mxu0 %v1230_v56 }
 0x5fa   :  { %1258 = vmatpush.msra.mxu0 %v1227_v1 }
 0x5fc   :  { %1259 = vmatpush.msra.mxu0 %v1224_v4 }
 0x5fe   :  { %1260 = vmatpush.msra.mxu0 %v1221_v19 }
 0x600   :  { %1261 = vmatpush.msra.mxu0 %v1218_v25  ;;  %v1319_v25 = vrot.slane %v3322_v47, 1 }
 0x602   :  { %1262 = vmatpush.msra.mxu0 %v1215_v36 }
 0x604   :  { %1263 = vmatpush.msra.mxu0 %v1212_v7  ;;  %v1367_v7 = vrot.slane %v3322_v47, 7 }
 0x606   :  { %1264 = vmatpush.msra.mxu0 %v1209_v27 }
 0x608   :  { %1265 = vmatpush.msra.mxu0 %v1206_v52  ;;  %v3829_v52 = vld [vmem:[#allocation29_spill] sm:$0xff] }
 0x60a   :  { %1266 = vmatpush.msra.mxu0 %v1203_v41  ;;  %v1320_v41 = vrot.slane %v3317_v54, 1 }
 0x60b   :  { %1267 = vmatmul.f32.vlgmr.msra.gmra.mxu0 %v2625_v14  ;;  %v1364_v14 = vrot.slane %v3265_v18, 7 }
 0x613   :  { %1270 = vmatmul.f32.gmra.mxu0 %v2633_v9  ;;  %v1317_v9 = vrot.slane %v3328_v43, 1 }
 0x61b   :  { %1273 = vmatmul.f32.gmra.mxu0 %v2642_v5  ;;  %v3822_v5 = vrot.slane %v3270_v55, 7  ;;  %v3826_v55 = vld [vmem:[#allocation25_spill] sm:$0xff] }
 0x623   :  { %1276 = vmatmul.f32.gmra.mxu0 %v2651_v21  ;;  %v1395_v21 = vsel %vm944_vm0, %v3822_v5, %v1364_v14  ;;  %v1392_v5 = vsel %vm944_vm0, %v1366_v61, %v1367_v7 }
 0x62b   :  { %1279 = vmatmul.f32.gmra.mxu0 %v2660_v26  ;;  %v3823_v26 = vrot.slane %v3265_v18, 1 }
 0x633   :  { %1282 = vmatmul.f32.gmra.mxu0 %v2669_v30  ;;  %v1346_v30 = vsel %vm815_vm1, %v3823_v26, %v1317_v9 }
 0x63b   :  { %1285 = vmatmul.f32.gmra.mxu0 %v2678_v35  ;;  %v3824_v35 = vld [vmem:[#allocation27_spill] sm:$0xff] }
 0x643   :  { %1288 = vmatmul.f32.gmra.mxu0 %v2687_v39  ;;  %v1396_v39 = vmul.f32 %v1395_v21, %v3824_v35  ;;  %v3830_v21 = vld [vmem:[#allocation30_spill] sm:$0xff]  ;;  %v3831_v35 = vld [vmem:[#allocation31_spill] sm:$0xff] }
 0x64b   :  { %1291 = vmatmul.f32.gmra.mxu0 %v2696_v44  ;;  %v1318_v44 = vrot.slane %v3325_v28, 1 }
 0x64d   :  { %v1344_v4 = vsel %vm815_vm1, %v1318_v44, %v1319_v25 }
 0x64e   :  { %v1350_v42 = vmul.f32 %v1344_v4, %v3828_v45  ;;  %v1323_v4 = vrot.slane %v3302_v59, 1  ;;  %v1370_v45 = vrot.slane %v3307_v16, 7 }
 0x653   :  { %1294 = vmatmul.f32.gmra.mxu0 %v2705_v48  ;;  %v3825_v48 = vld [vmem:[#allocation24_spill] sm:$0xff] }
 0x65b   :  { %1297 = vmatmul.f32.gmra.mxu0 %v2714_v53  ;;  %v1348_v53 = vmul.f32 %v1346_v30, %v3825_v48  ;;  %v1321_v30 = vrot.slane %v3312_v58, 1 }
 0x663   :  { %1300 = vmatmul.f32.gmra.mxu0 %v2723_v57  ;;  %v1365_v57 = vrot.slane %v3328_v43, 7 }
 0x665   :  { %v1394_v18 = vsel %vm944_vm0, %v1364_v14, %v1365_v57  ;;  %v1393_v20 = vsel %vm944_vm0, %v1365_v57, %v1366_v61  ;;  %v1343_v14 = vsel %vm815_vm1, %v1319_v25, %v1320_v41 }
 0x666   :  { %v1397_v29 = vmul.f32 %v1394_v18, %v3827_v34  ;;  %v1398_v27 = vmul.f32 %v1393_v20, %v3829_v52  ;;  %v1351_v26 = vmul.f32 %v1343_v14, %v3830_v21  ;;  %v3833_v18 = vld [vmem:[#allocation33_spill] sm:$0xff] }
 0x667   :  { %v3837_v14 = vld [vmem:[#allocation37_spill] sm:$0xff] }
 0x668   :  { %v1414_v36 = vadd.f32 %v1398_v27, %v1350_v42 }
 0x66b   :  { %1303 = vmatmul.f32.gmra.mxu0 %v2732_v62  ;;  %v1412_v62 = vadd.f32 %v1396_v39, %v1348_v53  ;;  %v1399_v39 = vmul.f32 %v1392_v5, %v3831_v35  ;;  %v1342_v53 = vsel %vm815_vm1, %v1320_v41, %v1321_v30  ;;  %v1371_v5 = vrot.slane %v3302_v59, 7 }
 0x66d   :  { %v1415_v48 = vadd.f32 %v1399_v39, %v1351_v26  ;;  %v1388_v35 = vsel %vm944_vm0, %v1370_v45, %v1371_v5  ;;  %v3838_v39 = vld [vmem:[#allocation38_spill] sm:$0xff] }
 0x673   :  { %1306 = vmatmul.f32.gmra.mxu0 %v2737_v2 }
 0x67b   :  { %1309 = vmatmul.f32.gmra.mxu0 %v2746_v10  ;;  %v1345_v10 = vsel %vm815_vm1, %v1317_v9, %v1318_v44  ;;  %v1368_v44 = vrot.slane %v3317_v54, 7 }
 0x683   :  { %1312 = vmatmul.f32.gmra.mxu0 %v2757_v15  ;;  %v1349_v15 = vmul.f32 %v1345_v10, %v3826_v55 }
 0x685   :  { %v1413_v1 = vadd.f32 %v1397_v29, %v1349_v15  ;;  %v1369_v15 = vrot.slane %v3312_v58, 7 }
 0x687   :  { %v1390_v61 = vsel %vm944_vm0, %v1368_v44, %v1369_v15  ;;  %v1389_v27 = vsel %vm944_vm0, %v1369_v15, %v1370_v45  ;;  %v3843_v15 = vld [vmem:[#allocation44_spill] sm:$0xff] }
 0x688   :  { %v1268_v2 = vpop.f32.mrf.mxu0 }
 0x689   :  { %v1428_v19 = vsub.f32 %v1268_v2, %v1412_v62  ;;  %v1391_v62 = vsel %vm944_vm0, %v1367_v7, %v1368_v44  ;;  %v3832_v2 = vld [vmem:[#allocation32_spill] sm:$0xff] }
 0x68a   :  { %v1352_v10 = vmul.f32 %v1342_v53, %v3832_v2  ;;  %v1400_v55 = vmul.f32 %v1391_v62, %v3833_v18  ;;  %v3836_v7 = vld [vmem:[#allocation36_spill] sm:$0xff]  ;;  %v3840_v62 = vrot.slane %v3204_v11, 1  ;;  %v3842_v18 = vld [vmem:[#allocation42_spill] sm:$0xff] }
 0x68b   :  { %1460 = vmatmul.f32.vlgmr.msra.gmra.mxu1 %v1428_v19  ;;  %v1322_v19 = vrot.slane %v3307_v16, 1  ;;  %v3844_v11 = vld [vmem:[#allocation48_spill] sm:$0xff] }
 0x68c   :  { %v1416_v25 = vadd.f32 %v1400_v55, %v1352_v10  ;;  %v3841_v10 = vrot.slane %v3206_v17, 7 }
 0x68d   :  { %v1341_v34 = vsel %vm815_vm1, %v1321_v30, %v1322_v19  ;;  %v1340_v41 = vsel %vm815_vm1, %v1322_v19, %v1323_v4 }
 0x68e   :  { %v1387_v19 = vsel %vm944_vm0, %v1371_v5, %v3841_v10 }
 0x690   :  { %v1271_v43 = vpop.f32.mrf.mxu0 }
 0x691   :  { %v1429_v56 = vsub.f32 %v1271_v43, %v1413_v1  ;;  %v3834_v1 = vld [vmem:[#allocation34_spill] sm:$0xff] }
 0x692   :  { %v1353_v43 = vmul.f32 %v1341_v34, %v3834_v1 }
 0x693   :  { %1463 = vmatmul.f32.gmra.mxu1 %v1429_v56  ;;  %v3835_v56 = vld [vmem:[#allocation35_spill] sm:$0xff] }
 0x694   :  { %v1401_v20 = vmul.f32 %v1390_v61, %v3835_v56 }
 0x696   :  { %v1417_v42 = vadd.f32 %v1401_v20, %v1353_v43 }
 0x698   :  { %v1274_v28 = vpop.f32.mrf.mxu0 }
 0x699   :  { %v1430_v9 = vsub.f32 %v1274_v28, %v1414_v36  ;;  %v1354_v36 = vmul.f32 %v1340_v41, %v3836_v7  ;;  %v1324_v28 = vrot.slane %v3206_v17, 1 }
 0x69b   :  { %1466 = vmatmul.f32.gmra.mxu1 %v1430_v9  ;;  %v1402_v9 = vmul.f32 %v1389_v27, %v3837_v14  ;;  %v1339_v26 = vsel %vm815_vm1, %v1323_v4, %v1324_v28  ;;  %v1338_v59 = vsel %vm815_vm1, %v1324_v28, %v3840_v62  ;;  %v3845_v4 = vld [vmem:[#allocation53_spill] sm:$0xff] }
 0x69c   :  { %v1355_v44 = vmul.f32 %v1339_v26, %v3838_v39  ;;  %v1356_v55 = vmul.f32 %v1338_v59, %v3842_v18  ;;  %v3849_v18 = vld [vmem:[#allocation47_spill] sm:$0xff] }
 0x69d   :  { %v1418_v21 = vadd.f32 %v1402_v9, %v1354_v36 }
 0x6a0   :  { %v1277_v47 = vpop.f32.mrf.mxu0 }
 0x6a1   :  { %v1431_v57 = vsub.f32 %v1277_v47, %v1415_v48  ;;  %v3839_v48 = vld [vmem:[#allocation40_spill] sm:$0xff] }
 0x6a2   :  { %v1403_v47 = vmul.f32 %v1388_v35, %v3839_v48 }
 0x6a3   :  { %1469 = vmatmul.f32.gmra.mxu1 %v1431_v57 }
 0x6a4   :  { %v1419_v53 = vadd.f32 %v1403_v47, %v1355_v44 }
 0x6a8   :  { %v1280_v54 = vpop.f32.mrf.mxu0 }
 0x6a9   :  { %v1432_v29 = vsub.f32 %v1280_v54, %v1416_v25  ;;  %v1404_v25 = vmul.f32 %v1387_v19, %v3843_v15 }
 0x6ab   :  { %1472 = vmatmul.f32.gmra.mxu1 %v1432_v29  ;;  %v1420_v54 = vadd.f32 %v1404_v25, %v1356_v55  ;;  %v3850_v25 = vld [vmem:[#allocation43_spill] sm:$0xff] }
 0x6b0   :  { %v1283_v58 = vpop.f32.mrf.mxu0 }
 0x6b1   :  { %v1433_v52 = vsub.f32 %v1283_v58, %v1417_v42 }
 0x6b3   :  { %1475 = vmatmul.f32.gmra.mxu1 %v1433_v52 }
 0x6b8   :  { %v1286_v16 = vpop.f32.mrf.mxu0 }
 0x6b9   :  { %v1434_v30 = vsub.f32 %v1286_v16, %v1418_v21 }
 0x6bb   :  { %1478 = vmatmul.f32.gmra.mxu1 %v1434_v30 }
 0x6c0   :  { %v1289_v57 = vpop.f32.mrf.mxu0 }
 0x6c1   :  { %v1435_v2 = vsub.f32 %v1289_v57, %v1419_v53  ;;  %v3847_v57 = vld [vmem:[#allocation55_spill] sm:$0xff] }
 0x6c3   :  { %1481 = vmatmul.f32.gmra.mxu1 %v1435_v2  ;;  %v3848_v2 = vld [vmem:[#allocation52_spill] sm:$0xff] }
 0x6c8   :  { %v1292_v34 = vpop.f32.mrf.mxu0 }
 0x6c9   :  { %v1436_v29 = vsub.f32 %v1292_v34, %v1420_v54 }
 0x6cb   :  { %1484 = vmatmul.f32.gmra.mxu1 %v1436_v29  ;;  %v3851_v29 = vld [vmem:[#allocation39_spill] sm:$0xff] }
 0x6d0   :  { %v1295_v61 = vpop.f32.mrf.mxu0 }
 0x6d1   :  { %v1437_v1 = vsub.f32 %v1295_v61, %v3844_v11 }
 0x6d3   :  { %1487 = vmatmul.f32.gmra.mxu1 %v1437_v1 }
 0x6d8   :  { %v1298_v43 = vpop.f32.mrf.mxu0 }
 0x6d9   :  { %v1438_v56 = vsub.f32 %v1298_v43, %v3845_v4 }
 0x6db   :  { %1490 = vmatmul.f32.gmra.mxu1 %v1438_v56 }
 0x6e0   :  { %v1301_v17 = vpop.f32.mrf.mxu0 }
 0x6e1   :  { %v1439_v20 = vsub.f32 %v1301_v17, %v3846_v12 }
 0x6e3   :  { %1493 = vmatmul.f32.gmra.mxu1 %v1439_v20 }
 0x6e8   :  { %v1304_v45 = vpop.f32.mrf.mxu0 }
 0x6e9   :  { %v1440_v42 = vsub.f32 %v1304_v45, %v3256_v22 }
 0x6eb   :  { %1496 = vmatmul.f32.gmra.mxu1 %v1440_v42 }
 0x6f0   :  { %v1307_v58 = vpop.f32.mrf.mxu0 }
 0x6f1   :  { %v1441_v41 = vsub.f32 %v1307_v58, %v3268_v0 }
 0x6f3   :  { %1499 = vmatmul.f32.gmra.mxu1 %v1441_v41 }
 0x6f8   :  { %v1310_v52 = vpop.f32.mrf.mxu0 }
 0x6f9   :  { %v1442_v27 = vsub.f32 %v1310_v52, %v3290_v33 }
 0x6fb   :  { %1502 = vmatmul.f32.gmra.mxu1 %v1442_v27 }
 0x700   :  { %v1313_v7 = vpop.f32.mrf.mxu0 }
 0x701   :  { %v1443_v36 = vsub.f32 %v1313_v7, %v3292_v50  ;;  %v3853_v7 = vld [vmem:[#allocation62_spill] sm:$0xff] }
 0x703   :  { %1505 = vmatmul.f32.gmra.mxu1 %v1443_v36 }
 0x708   :  { %v1461_v28 = vpop.f32.mrf.mxu1 }
 0x710   :  { %v1464_v14 = vpop.f32.mrf.mxu1 }
 0x718   :  { %v1467_v9 = vpop.f32.mrf.mxu1 }
 0x720   :  { %v1470_v5 = vpop.f32.mrf.mxu1 }
 0x721   :  { %v1512_v58 = vadd.f32 %v1470_v5, %v3007_v24  ;;  %v3854_v24 = vld [vmem:[#allocation72_spill] sm:$0xff]  ;;  %v1621_v5 = vld [vmem:[#allocation14 + $0x78] sm:$0xff] }
 0x722   :  { %1719 = vmatpush.msrb.mxu0 %v1621_v5 }
 0x723   :  { %v1528_v27 = vmax.f32 %v1512_v58, 0.0  ;;  %v1607_v58 = vld [vmem:[#allocation14 + $0x8] sm:$0xff] }
 0x728   :  { %v1473_v21 = vpop.f32.mrf.mxu1 }
 0x729   :  { %v1513_v45 = vadd.f32 %v1473_v21, %v2999_v31  ;;  %v1649_v21 = vld [vmem:[#allocation16 + $0x58] sm:$0xff] }
 0x72b   :  { %v1529_v52 = vmax.f32 %v1513_v45, 0.0  ;;  %v1608_v45 = vld [vmem:[#allocation14 + $0x10] sm:$0xff] }
 0x730   :  { %v1476_v16 = vpop.f32.mrf.mxu1 }
 0x731   :  { %v1514_v12 = vadd.f32 %v1476_v16, %v2991_v49  ;;  %v1509_v49 = vadd.f32 %v1461_v28, %v3853_v7  ;;  %v3857_v28 = vld [vmem:[#allocation75_spill] sm:$0xff] }
 0x732   :  { %v1622_v7 = vld [vmem:[#allocation14 + $0x80] sm:$0xff] }
 0x733   :  { %v1530_v41 = vmax.f32 %v1514_v12, 0.0  ;;  %v1525_v31 = vmax.f32 %v1509_v49, 0.0  ;;  %v1609_v12 = vld [vmem:[#allocation14 + $0x18] sm:$0xff]  ;;  %v2058_v49 = vld [vmem:[%s3605_s0 + $0x8] sm:$0xff] }
 0x738   :  { %v1479_v22 = vpop.f32.mrf.mxu1 }
 0x739   :  { %v1515_v56 = vadd.f32 %v1479_v22, %v2986_v13  ;;  %v1510_v13 = vadd.f32 %v1464_v14, %v3806_v60  ;;  %v3856_v60 = vld [vmem:[#allocation74_spill] sm:$0xff]  ;;  %v1619_v22 = vld [vmem:[#allocation14 + $0x68] sm:$0xff] }
 0x73a   :  { %v1653_v14 = vld [vmem:[#allocation16 + $0x78] sm:$0xff] }
 0x73b   :  { %v1531_v42 = vmax.f32 %v1515_v56, 0.0  ;;  %v1526_v16 = vmax.f32 %v1510_v13, 0.0  ;;  %1654 = vmatpush.msrb.mxu3 %v1653_v14  ;;  %v3861_v56 = vld [vmem:[#allocation79_spill] sm:$0xff]  ;;  %v3862_v13 = vld [vmem:[#allocation80_spill] sm:$0xff] }
 0x73c   :  { %v2066_v14 = vld [vmem:[%s3605_s0 + $0x48] sm:$0xff] }
 0x740   :  { %v1482_v26 = vpop.f32.mrf.mxu1 }
 0x741   :  { %v1516_v43 = vadd.f32 %v1482_v26, %v2981_v6  ;;  %v1511_v6 = vadd.f32 %v1467_v9, %v3015_v32  ;;  %v3855_v32 = vld [vmem:[#allocation73_spill] sm:$0xff] }
 0x742   :  { %v1652_v9 = vld [vmem:[#allocation16 + $0x70] sm:$0xff] }
 0x743   :  { %v1532_v20 = vmax.f32 %v1516_v43, 0.0  ;;  %v1527_v36 = vmax.f32 %v1511_v6, 0.0  ;;  %1655 = vmatpush.msrb.mxu3 %v1652_v9  ;;  %v1636_v26 = vld [vmem:[#allocation14 + $0xf0] sm:$0xff]  ;;  %v1610_v43 = vld [vmem:[#allocation14 + $0x20] sm:$0xff]  ;;  %v2067_v9 = vld [vmem:[%s3605_s0 + $0x50] sm:$0xff] }
 0x744   :  { %v1606_v6 = vld [vmem:[#allocation14] sm:$0xff] }
 0x748   :  { %v1485_v30 = vpop.f32.mrf.mxu1 }
 0x750   :  { %v1488_v35 = vpop.f32.mrf.mxu1 }
 0x751   :  { %v1518_v61 = vadd.f32 %v1488_v35, %v3851_v29  ;;  %v3859_v35 = vld [vmem:[#allocation77_spill] sm:$0xff] }
 0x752   :  { %v1612_v29 = vld [vmem:[#allocation14 + $0x30] sm:$0xff] }
 0x753   :  { %v1534_v4 = vmax.f32 %v1518_v61, 0.0  ;;  %v1629_v61 = vld [vmem:[#allocation14 + $0xb8] sm:$0xff] }
 0x758   :  { %v1491_v0 = vpop.f32.mrf.mxu1 }
 0x759   :  { %v1519_v54 = vadd.f32 %v1491_v0, %v3850_v25  ;;  %v1647_v0 = vld [vmem:[#allocation16 + $0x48] sm:$0xff]  ;;  %v1613_v25 = vld [vmem:[#allocation14 + $0x38] sm:$0xff] }
 0x75b   :  { %v1535_v1 = vmax.f32 %v1519_v54, 0.0  ;;  %v1630_v54 = vld [vmem:[#allocation14 + $0xc0] sm:$0xff] }
 0x760   :  { %v1494_v39 = vpop.f32.mrf.mxu1 }
 0x761   :  { %v1520_v55 = vadd.f32 %v1494_v39, %v3849_v18  ;;  %v1618_v39 = vld [vmem:[#allocation14 + $0x60] sm:$0xff] }
 0x762   :  { %v1614_v18 = vld [vmem:[#allocation14 + $0x40] sm:$0xff] }
 0x768   :  { %v1497_v44 = vpop.f32.mrf.mxu1 }
 0x769   :  { %v1521_v10 = vadd.f32 %v1497_v44, %v3848_v2  ;;  %v1635_v44 = vld [vmem:[#allocation14 + $0xe8] sm:$0xff]  ;;  %v1632_v2 = vld [vmem:[#allocation14 + $0xd0] sm:$0xff] }
 0x76b   :  { %v1537_v34 = vmax.f32 %v1521_v10, 0.0  ;;  %v3860_v10 = vld [vmem:[#allocation78_spill] sm:$0xff] }
 0x770   :  { %v1500_v48 = vpop.f32.mrf.mxu1 }
 0x771   :  { %v1522_v62 = vadd.f32 %v1500_v48, %v3847_v57  ;;  %v1646_v48 = vld [vmem:[#allocation16 + $0x40] sm:$0xff]  ;;  %v1633_v57 = vld [vmem:[#allocation14 + $0xd8] sm:$0xff] }
 0x773   :  { %v1538_v15 = vmax.f32 %v1522_v62, 0.0  ;;  %v1644_v62 = vld [vmem:[#allocation16 + $0x30] sm:$0xff] }
 0x778   :  { %v1503_v33 = vpop.f32.mrf.mxu1 }
 0x779   :  { %v1523_v53 = vadd.f32 %v1503_v33, %v3801_v63  ;;  %v1536_v63 = vmax.f32 %v1520_v55, 0.0  ;;  %v1617_v33 = vld [vmem:[#allocation14 + $0x58] sm:$0xff]  ;;  %v1631_v55 = vld [vmem:[#allocation14 + $0xc8] sm:$0xff] }
 0x77b   :  { %v1539_v19 = vmax.f32 %v1523_v53, 0.0  ;;  %v1645_v53 = vld [vmem:[#allocation16 + $0x38] sm:$0xff] }
 0x780   :  { %v1506_v47 = vpop.f32.mrf.mxu1 }
 0x781   :  { %v1524_v50 = vadd.f32 %v1506_v47, %v3805_v37  ;;  %v3852_v37 = vld [vmem:[#allocation41_spill] sm:$0xff]  ;;  %v1634_v47 = vld [vmem:[#allocation14 + $0xe0] sm:$0xff] }
 0x782   :  { %v1517_v11 = vadd.f32 %v1485_v30, %v3852_v37  ;;  %v1648_v30 = vld [vmem:[#allocation16 + $0x50] sm:$0xff]  ;;  %v1611_v37 = vld [vmem:[#allocation14 + $0x28] sm:$0xff] }
 0x783   :  { %v1540_v59 = vmax.f32 %v1524_v50, 0.0  ;;  %v1616_v50 = vld [vmem:[#allocation14 + $0x50] sm:$0xff] }
 0x784   :  { %v1533_v17 = vmax.f32 %v1517_v11, 0.0  ;;  %v1628_v11 = vld [vmem:[#allocation14 + $0xb0] sm:$0xff] }
 0x785   :  { %1541 = vmatpush.msrb.mxu2 %v1540_v59  ;;  %v1615_v59 = vld [vmem:[#allocation14 + $0x48] sm:$0xff] }
 0x787   :  { %1542 = vmatpush.msrb.mxu2 %v1539_v19  ;;  %v1643_v19 = vld [vmem:[#allocation16 + $0x28] sm:$0xff] }
 0x789   :  { %1543 = vmatpush.msrb.mxu2 %v1538_v15  ;;  %v1642_v15 = vld [vmem:[#allocation16 + $0x20] sm:$0xff] }
 0x78b   :  { %1544 = vmatpush.msrb.mxu2 %v1537_v34  ;;  %v1641_v34 = vld [vmem:[#allocation16 + $0x18] sm:$0xff] }
 0x78d   :  { %1545 = vmatpush.msrb.mxu2 %v1536_v63  ;;  %v1640_v63 = vld [vmem:[#allocation16 + $0x10] sm:$0xff] }
 0x78f   :  { %1546 = vmatpush.msrb.mxu2 %v1535_v1  ;;  %v1639_v1 = vld [vmem:[#allocation16 + $0x8] sm:$0xff] }
 0x791   :  { %1547 = vmatpush.msrb.mxu2 %v1534_v4  ;;  %v1627_v4 = vld [vmem:[#allocation14 + $0xa8] sm:$0xff] }
 0x793   :  { %1548 = vmatpush.msrb.mxu2 %v1533_v17  ;;  %v1638_v17 = vld [vmem:[#allocation16] sm:$0xff] }
 0x795   :  { %1549 = vmatpush.msrb.mxu2 %v1532_v20  ;;  %v1626_v20 = vld [vmem:[#allocation14 + $0xa0] sm:$0xff] }
 0x797   :  { %1550 = vmatpush.msrb.mxu2 %v1531_v42  ;;  %v1625_v42 = vld [vmem:[#allocation14 + $0x98] sm:$0xff] }
 0x799   :  { %1551 = vmatpush.msrb.mxu2 %v1530_v41  ;;  %v1624_v41 = vld [vmem:[#allocation14 + $0x90] sm:$0xff] }
 0x79b   :  { %1552 = vmatpush.msrb.mxu2 %v1529_v52  ;;  %v1623_v52 = vld [vmem:[#allocation14 + $0x88] sm:$0xff] }
 0x79d   :  { %1553 = vmatpush.msrb.mxu2 %v1528_v27  ;;  %v2057_v27 = vld [vmem:[%s3605_s0] sm:$0xff] }
 0x79f   :  { %1554 = vmatpush.msrb.mxu2 %v1527_v36  ;;  %v2059_v36 = vld [vmem:[%s3605_s0 + $0x10] sm:$0xff] }
 0x7a1   :  { %1555 = vmatpush.msrb.mxu2 %v1526_v16  ;;  %v2060_v16 = vld [vmem:[%s3605_s0 + $0x18] sm:$0xff] }
 0x7a3   :  { %1556 = vmatpush.msrb.mxu2 %v1525_v31  ;;  %v2061_v31 = vld [vmem:[%s3605_s0 + $0x20] sm:$0xff] }
 0x7a4   :  { %1557 = vmatmul.f32.vlgmr.msrb.gmra.mxu2 %v3807_v51  ;;  %v3858_v51 = vld [vmem:[#allocation76_spill] sm:$0xff] }
 0x7ac   :  { %1560 = vmatmul.f32.gmra.mxu2 %v3808_v40  ;;  %v1651_v40 = vld [vmem:[#allocation16 + $0x68] sm:$0xff] }
 0x7ad   :  { %1656 = vmatpush.msrb.mxu3 %v1651_v40  ;;  %v2068_v40 = vld [vmem:[%s3605_s0 + $0x58] sm:$0xff] }
 0x7b4   :  { %1563 = vmatmul.f32.gmra.mxu2 %v3809_v3  ;;  %v1650_v3 = vld [vmem:[#allocation16 + $0x60] sm:$0xff] }
 0x7b5   :  { %1657 = vmatpush.msrb.mxu3 %v1650_v3  ;;  %v2069_v3 = vld [vmem:[%s3605_s0 + $0x60] sm:$0xff] }
 0x7b7   :  { %1658 = vmatpush.msrb.mxu3 %v1649_v21 }
 0x7b9   :  { %1659 = vmatpush.msrb.mxu3 %v1648_v30 }
 0x7bb   :  { %1660 = vmatpush.msrb.mxu3 %v1647_v0  ;;  %v2075_v0 = vld [vmem:[%s3605_s0 + $0x90] sm:$0xff] }
 0x7bc   :  { %1566 = vmatmul.f32.gmra.mxu2 %v3810_v23  ;;  %v1620_v23 = vld [vmem:[#allocation14 + $0x70] sm:$0xff] }
 0x7bd   :  { %1720 = vmatpush.msrb.mxu0 %v1620_v23  ;;  %1661 = vmatpush.msrb.mxu3 %v1646_v48  ;;  %v2070_v23 = vld [vmem:[%s3605_s0 + $0x68] sm:$0xff]  ;;  %v2077_v48 = vld [vmem:[%s3605_s0 + $0xa0] sm:$0xff] }
 0x7bf   :  { %1721 = vmatpush.msrb.mxu0 %v1619_v22  ;;  %1662 = vmatpush.msrb.mxu3 %v1645_v53  ;;  %v2072_v22 = vld [vmem:[%s3605_s0 + $0x78] sm:$0xff]  ;;  %v2079_v53 = vld [vmem:[%s3605_s0 + $0xb0] sm:$0xff] }
 0x7c1   :  { %1722 = vmatpush.msrb.mxu0 %v1618_v39  ;;  %1663 = vmatpush.msrb.mxu3 %v1644_v62  ;;  %v2081_v62 = vld [vmem:[%s3605_s0 + $0xc0] sm:$0xff] }
 0x7c3   :  { %1723 = vmatpush.msrb.mxu0 %v1617_v33  ;;  %1664 = vmatpush.msrb.mxu3 %v1643_v19 }
 0x7c4   :  { %1569 = vmatmul.f32.gmra.mxu2 %v3811_v46  ;;  %v1637_v46 = vld [vmem:[#allocation14 + $0xf8] sm:$0xff] }
 0x7c5   :  { %1784 = vmatpush.msrb.mxu1 %v1637_v46  ;;  %1724 = vmatpush.msrb.mxu0 %v1616_v50  ;;  %v2071_v46 = vld [vmem:[%s3605_s0 + $0x70] sm:$0xff] }
 0x7c6   :  { %1665 = vmatpush.msrb.mxu3 %v1642_v15 }
 0x7c7   :  { %1785 = vmatpush.msrb.mxu1 %v1636_v26  ;;  %1725 = vmatpush.msrb.mxu0 %v1615_v59  ;;  %v2073_v26 = vld [vmem:[%s3605_s0 + $0x80] sm:$0xff] }
 0x7c8   :  { %1666 = vmatpush.msrb.mxu3 %v1641_v34 }
 0x7c9   :  { %1786 = vmatpush.msrb.mxu1 %v1635_v44  ;;  %1726 = vmatpush.msrb.mxu0 %v1614_v18  ;;  %v2076_v44 = vld [vmem:[%s3605_s0 + $0x98] sm:$0xff] }
 0x7ca   :  { %1667 = vmatpush.msrb.mxu3 %v1640_v63  ;;  %v2084_v18 = vld [vmem:[%s3605_s0 + $0xd8] sm:$0xff] }
 0x7cb   :  { %1787 = vmatpush.msrb.mxu1 %v1634_v47  ;;  %1727 = vmatpush.msrb.mxu0 %v1613_v25  ;;  %v2078_v47 = vld [vmem:[%s3605_s0 + $0xa8] sm:$0xff] }
 0x7cc   :  { %1572 = vmatmul.f32.gmra.mxu2 %v3854_v24  ;;  %1668 = vmatpush.msrb.mxu3 %v1639_v1  ;;  %v2063_v24 = vld [vmem:[%s3605_s0 + $0x30] sm:$0xff]  ;;  %v2086_v25 = vld [vmem:[%s3605_s0 + $0xe8] sm:$0xff] }
 0x7cd   :  { %1788 = vmatpush.msrb.mxu1 %v1633_v57  ;;  %1728 = vmatpush.msrb.mxu0 %v1612_v29  ;;  %v2080_v57 = vld [vmem:[%s3605_s0 + $0xb8] sm:$0xff] }
 0x7ce   :  { %1669 = vmatpush.msrb.mxu3 %v1638_v17  ;;  %v2088_v29 = vld [vmem:[%s3605_s0 + $0xf8] sm:$0xff] }
 0x7cf   :  { %1789 = vmatpush.msrb.mxu1 %v1632_v2  ;;  %1729 = vmatpush.msrb.mxu0 %v1611_v37  ;;  %v2082_v2 = vld [vmem:[%s3605_s0 + $0xc8] sm:$0xff] }
 0x7d1   :  { %1790 = vmatpush.msrb.mxu1 %v1631_v55  ;;  %1730 = vmatpush.msrb.mxu0 %v1610_v43  ;;  %v2085_v55 = vld [vmem:[%s3605_s0 + $0xe0] sm:$0xff] }
 0x7d3   :  { %1791 = vmatpush.msrb.mxu1 %v1630_v54  ;;  %1731 = vmatpush.msrb.mxu0 %v1609_v12  ;;  %v2087_v54 = vld [vmem:[%s3605_s0 + $0xf0] sm:$0xff] }
 0x7d4   :  { %1575 = vmatmul.f32.gmra.mxu2 %v3855_v32 }
 0x7d5   :  { %1792 = vmatpush.msrb.mxu1 %v1629_v61  ;;  %1732 = vmatpush.msrb.mxu0 %v1608_v45 }
 0x7d7   :  { %1793 = vmatpush.msrb.mxu1 %v1628_v11  ;;  %1733 = vmatpush.msrb.mxu0 %v1607_v58 }
 0x7d9   :  { %1794 = vmatpush.msrb.mxu1 %v1627_v4  ;;  %1734 = vmatpush.msrb.mxu0 %v1606_v6 }
 0x7da   :  { %1735 = vmatmul.f32.vlgmr.msrb.gmra.mxu0 %v2057_v27 }
 0x7db   :  { %1795 = vmatpush.msrb.mxu1 %v1626_v20 }
 0x7dc   :  { %1578 = vmatmul.f32.gmra.mxu2 %v3856_v60  ;;  %v2065_v60 = vld [vmem:[%s3605_s0 + $0x40] sm:$0xff] }
 0x7dd   :  { %1796 = vmatpush.msrb.mxu1 %v1625_v42 }
 0x7df   :  { %1797 = vmatpush.msrb.mxu1 %v1624_v41 }
 0x7e1   :  { %1798 = vmatpush.msrb.mxu1 %v1623_v52 }
 0x7e2   :  { %1738 = vmatmul.f32.gmra.mxu0 %v2059_v36 }
 0x7e3   :  { %1799 = vmatpush.msrb.mxu1 %v1622_v7 }
 0x7e4   :  { %1581 = vmatmul.f32.gmra.mxu2 %v3857_v28  ;;  %1800 = vmatmul.f32.vlgmr.msrb.gmra.mxu1 %v2058_v49 }
 0x7ea   :  { %1741 = vmatmul.f32.gmra.mxu0 %v2061_v31 }
 0x7ec   :  { %1584 = vmatmul.f32.gmra.mxu2 %v3858_v51  ;;  %1803 = vmatmul.f32.gmra.mxu1 %v2060_v16 }
 0x7f2   :  { %1744 = vmatmul.f32.gmra.mxu0 %v2063_v24 }
 0x7f4   :  { %1587 = vmatmul.f32.gmra.mxu2 %v3859_v35  ;;  %v2074_v35 = vld [vmem:[%s3605_s0 + $0x88] sm:$0xff] }
 0x7fa   :  { %1747 = vmatmul.f32.gmra.mxu0 %v2065_v60 }
 0x7fc   :  { %1590 = vmatmul.f32.gmra.mxu2 %v3860_v10  ;;  %v2083_v10 = vld [vmem:[%s3605_s0 + $0xd0] sm:$0xff] }
 0x802   :  { %1750 = vmatmul.f32.gmra.mxu0 %v2067_v9 }
 0x804   :  { %1593 = vmatmul.f32.gmra.mxu2 %v3861_v56 }
 0x80a   :  { %1753 = vmatmul.f32.gmra.mxu0 %v2069_v3 }
 0x80c   :  { %1596 = vmatmul.f32.gmra.mxu2 %v3862_v13 }
 0x812   :  { %1756 = vmatmul.f32.gmra.mxu0 %v2071_v46 }
 0x814   :  { %1599 = vmatmul.f32.gmra.mxu2 %v3821_v38  ;;  %v2062_v38 = vld [vmem:[%s3605_s0 + $0x28] sm:$0xff] }
 0x815   :  { %1806 = vmatmul.f32.gmra.mxu1 %v2062_v38 }
 0x81a   :  { %1759 = vmatmul.f32.gmra.mxu0 %v2073_v26 }
 0x81c   :  { %1602 = vmatmul.f32.gmra.mxu2 %v3084_v8  ;;  %v2064_v8 = vld [vmem:[%s3605_s0 + $0x38] sm:$0xff] }
 0x81d   :  { %1809 = vmatmul.f32.gmra.mxu1 %v2064_v8 }
 0x822   :  { %1762 = vmatmul.f32.gmra.mxu0 %v2075_v0 }
 0x825   :  { %1812 = vmatmul.f32.gmra.mxu1 %v2066_v14 }
 0x827   :  { %v1558_v32 = vpop.f32.mrf.mxu2 }
 0x828   :  { %1670 = vmatmul.f32.vlgmr.msrb.gmra.mxu3 %v1558_v32 }
 0x82a   :  { %1765 = vmatmul.f32.gmra.mxu0 %v2077_v48 }
 0x82d   :  { %1815 = vmatmul.f32.gmra.mxu1 %v2068_v40 }
 0x82f   :  { %v1561_v28 = vpop.f32.mrf.mxu2 }
 0x830   :  { %1673 = vmatmul.f32.gmra.mxu3 %v1561_v28 }
 0x832   :  { %1768 = vmatmul.f32.gmra.mxu0 %v2079_v53 }
 0x835   :  { %1818 = vmatmul.f32.gmra.mxu1 %v2070_v23 }
 0x837   :  { %v1564_v51 = vpop.f32.mrf.mxu2 }
 0x838   :  { %1676 = vmatmul.f32.gmra.mxu3 %v1564_v51 }
 0x83a   :  { %1771 = vmatmul.f32.gmra.mxu0 %v2081_v62 }
 0x83d   :  { %1821 = vmatmul.f32.gmra.mxu1 %v2072_v22 }
 0x83f   :  { %v1567_v5 = vpop.f32.mrf.mxu2 }
 0x840   :  { %1679 = vmatmul.f32.gmra.mxu3 %v1567_v5 }
 0x842   :  { %1774 = vmatmul.f32.gmra.mxu0 %v2083_v10 }
 0x845   :  { %1824 = vmatmul.f32.gmra.mxu1 %v2074_v35 }
 0x847   :  { %v1570_v21 = vpop.f32.mrf.mxu2 }
 0x848   :  { %1682 = vmatmul.f32.gmra.mxu3 %v1570_v21 }
 0x84a   :  { %1777 = vmatmul.f32.gmra.mxu0 %v2085_v55 }
 0x84d   :  { %1827 = vmatmul.f32.gmra.mxu1 %v2076_v44 }
 0x84f   :  { %v1573_v30 = vpop.f32.mrf.mxu2 }
 0x850   :  { %1685 = vmatmul.f32.gmra.mxu3 %v1573_v30 }
 0x852   :  { %1780 = vmatmul.f32.gmra.mxu0 %v2087_v54 }
 0x855   :  { %1830 = vmatmul.f32.gmra.mxu1 %v2078_v47 }
 0x857   :  { %v1576_v39 = vpop.f32.mrf.mxu2  ;;  %v1736_v61 = vpop.f32.mrf.mxu0 }
 0x858   :  { %1688 = vmatmul.f32.gmra.mxu3 %v1576_v39 }
 0x85d   :  { %1833 = vmatmul.f32.gmra.mxu1 %v2080_v57 }
 0x85f   :  { %v1579_v33 = vpop.f32.mrf.mxu2  ;;  %v1739_v11 = vpop.f32.mrf.mxu0 }
 0x860   :  { %1691 = vmatmul.f32.gmra.mxu3 %v1579_v33 }
 0x861   :  { %v1801_v63 = vpop.f32.mrf.mxu1 }
 0x865   :  { %1836 = vmatmul.f32.gmra.mxu1 %v2082_v2 }
 0x867   :  { %v1582_v50 = vpop.f32.mrf.mxu2  ;;  %v1742_v56 = vpop.f32.mrf.mxu0 }
 0x868   :  { %1694 = vmatmul.f32.gmra.mxu3 %v1582_v50 }
 0x869   :  { %v1804_v43 = vpop.f32.mrf.mxu1 }
 0x86d   :  { %1839 = vmatmul.f32.gmra.mxu1 %v2084_v18 }
 0x86f   :  { %v1585_v59 = vpop.f32.mrf.mxu2  ;;  %v1745_v12 = vpop.f32.mrf.mxu0 }
 0x870   :  { %1697 = vmatmul.f32.gmra.mxu3 %v1585_v59 }
 0x875   :  { %1842 = vmatmul.f32.gmra.mxu1 %v2086_v25 }
 0x877   :  { %v1588_v19 = vpop.f32.mrf.mxu2  ;;  %v1748_v6 = vpop.f32.mrf.mxu0 }
 0x878   :  { %1700 = vmatmul.f32.gmra.mxu3 %v1588_v19 }
 0x87d   :  { %1845 = vmatmul.f32.gmra.mxu1 %v2088_v29 }
 0x87f   :  { %v1591_v15 = vpop.f32.mrf.mxu2  ;;  %v1751_v36 = vpop.f32.mrf.mxu0 }
 0x880   :  { %1703 = vmatmul.f32.gmra.mxu3 %v1591_v15 }
 0x887   :  { %v1594_v34 = vpop.f32.mrf.mxu2  ;;  %v1754_v8 = vpop.f32.mrf.mxu0 }
 0x888   :  { %1706 = vmatmul.f32.gmra.mxu3 %v1594_v34 }
 0x88f   :  { %v1597_v37 = vpop.f32.mrf.mxu2  ;;  %v1757_v51 = vpop.f32.mrf.mxu0 }
 0x890   :  { %1709 = vmatmul.f32.gmra.mxu3 %v1597_v37 }
 0x892   :  { %v1807_v17 = vpop.f32.mrf.mxu1 }
 0x897   :  { %v1600_v1 = vpop.f32.mrf.mxu2  ;;  %v1760_v21 = vpop.f32.mrf.mxu0 }
 0x898   :  { %1712 = vmatmul.f32.gmra.mxu3 %v1600_v1 }
 0x89a   :  { %v1810_v45 = vpop.f32.mrf.mxu1 }
 0x89f   :  { %v1603_v4 = vpop.f32.mrf.mxu2  ;;  %v1763_v39 = vpop.f32.mrf.mxu0 }
 0x8a0   :  { %1715 = vmatmul.f32.gmra.mxu3 %v1603_v4 }
 0x8a2   :  { %v1813_v13 = vpop.f32.mrf.mxu1 }
 0x8a7   :  { %v1766_v50 = vpop.f32.mrf.mxu0 }
 0x8aa   :  { %v1816_v31 = vpop.f32.mrf.mxu1 }
 0x8ab   :  { %v1671_v20 = vpop.f32.mrf.mxu3 }
 0x8ac   :  { %v1737_v42 = vadd.f32 %v1736_v61, %v1671_v20  ;;  %v2056_v20 = vld [vmem:[%s3617_s12] ss:$0 sm:$0xff]  ;;  %s2355_s12 = smov [#allocation17]  }
 0x8ad   :  { %s1912_s15 = sshll.u32 %s2355_s12, 4  ;;  %s1913_s15 = int_to_ptr.vmem [resolvable:$true] %s1912_s15 }
 0x8ae   :  { %v3578_v58 = vadd.f32 %v1801_v63, %v1737_v42 }
 0x8af   :  { %v1769_v59 = vpop.f32.mrf.mxu0 }
 0x8b2   :  { %v1819_v60 = vpop.f32.mrf.mxu1 }
 0x8b3   :  { %v1674_v41 = vpop.f32.mrf.mxu3 }
 0x8b4   :  { %v1740_v52 = vadd.f32 %v1739_v11, %v1674_v41 }
 0x8b6   :  { %v3580_v27 = vadd.f32 %v1804_v43, %v1740_v52 }
 0x8b7   :  { %v1772_v18 = vpop.f32.mrf.mxu0 }
 0x8ba   :  { %v1822_v3 = vpop.f32.mrf.mxu1 }
 0x8bb   :  { %v1677_v7 = vpop.f32.mrf.mxu3 }
 0x8bc   :  { %v1743_v49 = vadd.f32 %v1742_v56, %v1677_v7 }
 0x8be   :  { %v3582_v16 = vadd.f32 %v1807_v17, %v1743_v49 }
 0x8bf   :  { %v1775_v25 = vpop.f32.mrf.mxu0 }
 0x8c2   :  { %v1825_v26 = vpop.f32.mrf.mxu1 }
 0x8c3   :  { %v1680_v38 = vpop.f32.mrf.mxu3 }
 0x8c4   :  { %v1746_v24 = vadd.f32 %v1745_v12, %v1680_v38 }
 0x8c6   :  { %v3584_v32 = vadd.f32 %v1810_v45, %v1746_v24 }
 0x8c7   :  { %v1778_v29 = vpop.f32.mrf.mxu0 }
 0x8ca   :  { %v1828_v48 = vpop.f32.mrf.mxu1 }
 0x8cb   :  { %v1683_v28 = vpop.f32.mrf.mxu3 }
 0x8cc   :  { %v1749_v14 = vadd.f32 %v1748_v6, %v1683_v28 }
 0x8ce   :  { %v3586_v9 = vadd.f32 %v1813_v13, %v1749_v14 }
 0x8cf   :  { %v1781_v11 = vpop.f32.mrf.mxu0 }
 0x8d2   :  { %v1831_v57 = vpop.f32.mrf.mxu1 }
 0x8d3   :  { %v1686_v40 = vpop.f32.mrf.mxu3 }
 0x8d4   :  { %v1752_v5 = vadd.f32 %v1751_v36, %v1686_v40 }
 0x8d6   :  { %v3588_v23 = vadd.f32 %v1816_v31, %v1752_v5 }
 0x8da   :  { %v1834_v10 = vpop.f32.mrf.mxu1 }
 0x8db   :  { %v1689_v46 = vpop.f32.mrf.mxu3 }
 0x8dc   :  { %v1755_v22 = vadd.f32 %v1754_v8, %v1689_v46 }
 0x8de   :  { %v3590_v30 = vadd.f32 %v1819_v60, %v1755_v22 }
 0x8e2   :  { %v1837_v55 = vpop.f32.mrf.mxu1 }
 0x8e3   :  { %v1692_v35 = vpop.f32.mrf.mxu3 }
 0x8e4   :  { %v1758_v0 = vadd.f32 %v1757_v51, %v1692_v35 }
 0x8e6   :  { %v1823_v44 = vadd.f32 %v1822_v3, %v1758_v0  ;;  %v1859_v0 = vadd.f32 %v2056_v20, %v3590_v30  ;;  %v1854_v30 = vadd.f32 %v2056_v20, %v3580_v27 }
 0x8ea   :  { %v1840_v54 = vpop.f32.mrf.mxu1 }
 0x8eb   :  { %v1695_v33 = vpop.f32.mrf.mxu3 }
 0x8ec   :  { %v1761_v47 = vadd.f32 %v1760_v21, %v1695_v33 }
 0x8ee   :  { %v1826_v53 = vadd.f32 %v1825_v26, %v1761_v47  ;;  %v1860_v26 = vadd.f32 %v2056_v20, %v1823_v44  ;;  %v1857_v47 = vadd.f32 %v2056_v20, %v3586_v9  ;;  %v1855_v44 = vadd.f32 %v2056_v20, %v3582_v16 }
 0x8f0   :  { %v1861_v21 = vadd.f32 %v2056_v20, %v1826_v53  ;;  %v1876_v33 = vmax.f32 %v1860_v26, 0.0 }
 0x8f2   :  { %v1843_v61 = vpop.f32.mrf.mxu1 }
 0x8f3   :  { %v1698_v62 = vpop.f32.mrf.mxu3 }
 0x8f4   :  { %v1764_v49 = vadd.f32 %v1763_v39, %v1698_v62  ;;  %v1877_v39 = vmax.f32 %v1861_v21, 0.0  ;;  %v1873_v62 = vmax.f32 %v1857_v47, 0.0 }
 0x8f6   :  { %v1829_v28 = vadd.f32 %v1828_v48, %v1764_v49  ;;  %v1858_v48 = vadd.f32 %v2056_v20, %v3588_v23  ;;  %v1853_v23 = vadd.f32 %v2056_v20, %v3578_v58 }
 0x8f8   :  { %v1862_v5 = vadd.f32 %v2056_v20, %v1829_v28  ;;  %v1874_v53 = vmax.f32 %v1858_v48, 0.0  ;;  %v1869_v9 = vmax.f32 %v1853_v23, 0.0 }
 0x8fa   :  { %v1846_v4 = vpop.f32.mrf.mxu1  ;;  %v1878_v35 = vmax.f32 %v1862_v5, 0.0 }
 0x8fb   :  { %v1701_v2 = vpop.f32.mrf.mxu3 }
 0x8fc   :  { %v1767_v6 = vadd.f32 %v1766_v50, %v1701_v2  ;;  %v1875_v50 = vmax.f32 %v1859_v0, 0.0  ;;  %v1871_v2 = vmax.f32 %v1855_v44, 0.0 }
 0x8fe   :  { %v1832_v24 = vadd.f32 %v1831_v57, %v1767_v6  ;;  %v1856_v57 = vadd.f32 %v2056_v20, %v3584_v32 }
 0x900   :  { %v1863_v40 = vadd.f32 %v2056_v20, %v1832_v24 }
 0x902   :  { %v1879_v22 = vmax.f32 %v1863_v40, 0.0 }
 0x903   :  { %v1704_v19 = vpop.f32.mrf.mxu3 }
 0x904   :  { %v1770_v45 = vadd.f32 %v1769_v59, %v1704_v19  ;;  %v1872_v59 = vmax.f32 %v1856_v57, 0.0  ;;  %v1885_v19 = vld [vmem:[#allocation8] sm:$0xff] }
 0x906   :  { %v1835_v36 = vadd.f32 %v1834_v10, %v1770_v45  ;;  %v1870_v10 = vmax.f32 %v1854_v30, 0.0 }
 0x908   :  { %v1864_v14 = vadd.f32 %v2056_v20, %v1835_v36 }
 0x90a   :  { %v1880_v46 = vmax.f32 %v1864_v14, 0.0 }
 0x90b   :  { %v1707_v15 = vpop.f32.mrf.mxu3 }
 0x90c   :  { %v1773_v56 = vadd.f32 %v1772_v18, %v1707_v15 }
 0x90e   :  { %v1838_v52 = vadd.f32 %v1837_v55, %v1773_v56 }
 0x910   :  { %v1865_v8 = vadd.f32 %v2056_v20, %v1838_v52 }
 0x912   :  { %v1881_v3 = vmax.f32 %v1865_v8, 0.0 }
 0x913   :  { %v1710_v34 = vpop.f32.mrf.mxu3 }
 0x914   :  { %v1776_v1 = vadd.f32 %v1775_v25, %v1710_v34 }
 0x916   :  { %v1841_v42 = vadd.f32 %v1840_v54, %v1776_v1 }
 0x918   :  { %v1866_v31 = vadd.f32 %v2056_v20, %v1841_v42 }
 0x91a   :  { %v1882_v51 = vmax.f32 %v1866_v31, 0.0 }
 0x91b   :  { %v1713_v63 = vpop.f32.mrf.mxu3 }
 0x91c   :  { %v1779_v37 = vadd.f32 %v1778_v29, %v1713_v63 }
 0x91e   :  { %v1844_v17 = vadd.f32 %v1843_v61, %v1779_v37 }
 0x920   :  { %v1867_v13 = vadd.f32 %v2056_v20, %v1844_v17 }
 0x922   :  { %v1883_v60 = vmax.f32 %v1867_v13, 0.0 }
 0x923   :  { %v1716_v43 = vpop.f32.mrf.mxu3 }
 0x924   :  { %v1782_v12 = vadd.f32 %v1781_v11, %v1716_v43 }
 0x926   :  { %v1847_v41 = vadd.f32 %v1846_v4, %v1782_v12 }
 0x928   :  { %v1868_v7 = vadd.f32 %v2056_v20, %v1847_v41 }
 0x92a   :  { %v1884_v38 = vmax.f32 %v1868_v7, 0.0 }
 0x92c   :  { %1886 = vmatpush.msra.mxu2 %v1884_v38 }
 0x92e   :  { %1887 = vmatpush.msra.mxu2 %v1883_v60 }
 0x930   :  { %1888 = vmatpush.msra.mxu2 %v1882_v51 }
 0x932   :  { %1889 = vmatpush.msra.mxu2 %v1881_v3 }
 0x934   :  { %1890 = vmatpush.msra.mxu2 %v1880_v46 }
 0x936   :  { %1891 = vmatpush.msra.mxu2 %v1879_v22 }
 0x938   :  { %1892 = vmatpush.msra.mxu2 %v1878_v35 }
 0x93a   :  { %1893 = vmatpush.msra.mxu2 %v1877_v39 }
 0x93c   :  { %1894 = vmatpush.msra.mxu2 %v1876_v33 }
 0x93e   :  { %1895 = vmatpush.msra.mxu2 %v1875_v50 }
 0x940   :  { %1896 = vmatpush.msra.mxu2 %v1874_v53 }
 0x942   :  { %1897 = vmatpush.msra.mxu2 %v1873_v62 }
 0x944   :  { %1898 = vmatpush.msra.mxu2 %v1872_v59 }
 0x946   :  { %1899 = vmatpush.msra.mxu2 %v1871_v2 }
 0x948   :  { %1900 = vmatpush.msra.mxu2 %v1870_v10 }
 0x94a   :  { %1901 = vmatpush.msra.mxu2 %v1869_v9 }
 0x94b   :  { %1902 = vmatmul.f32.vlgmr.msra.gmra.mxu2 %v1885_v19 }
 0x9ce   :  { %v1903_v27 = vpop.f32.mrf.mxu2 }
 0x9cf   :  { %1906 = vst [vmem:[#allocation17] sm:$0xff] %v1903_v27 }
 0x9d0   :  { %1917 = dma.vmem_to_hbm [thread:$0]  %s1913_s15, 128, %s1915_s2, [#allocation4]  }
 0x9d1   :  { %2339 = dma.done.wait [#allocation4], 128  }
 0x9d2   :  { %2340 = vsyncadd [#allocation4], 4294967168 }
 0x9d3   :  { %1922 = vsyncpa [#allocation3], 1 }
 0x9d4   :  { %1923 = vsyncpa [#allocation6], 1 }
 0x9d5   :  { %1924 = vsyncpa [#allocation9], 1 }
 0x9d6   :  { %1925 = vsyncpa [#allocation12], 1 }
 0x9d7   :  { %1926 = vsyncpa [#allocation15], 1 }
 0x9d8   :  { %1927 = vsyncpa [#allocation4], 1 }

</bundles_post_ra>
